<compile_context>
chip_gen: v7x
topology: tpu7x:2x2x1
jax: 0.10.0
libtpu: 0.0.40
codegen_flags: <defaults>
</compile_context>

<pallas_src>
import functools

import jax
import jax.numpy as jnp
from jax import lax
from jax.experimental import pallas as pl
from jax.experimental.pallas import tpu as pltpu

EPS = 1e-5
LANE = 128
SUBLANE = 8


def _round_up(x: int, m: int) -> int:
    return ((x + m - 1) // m) * m


# ---------------------------------------------------------------------------
# Stage 1:  h1 = relu(x @ W1 + b1);  accumulate per-feature sum / sum-of-squares.
# ---------------------------------------------------------------------------
def _stage1_kernel(x_ref, w1_ref, b1_ref, h1_ref, s1_ref, ss1_ref, *, n_rows, tb):
    bt = pl.program_id(0)

    @pl.when(bt == 0)
    def _init():
        s1_ref[...] = jnp.zeros_like(s1_ref)
        ss1_ref[...] = jnp.zeros_like(ss1_ref)

    h = jnp.dot(x_ref[...].astype(jnp.bfloat16), w1_ref[...],
                preferred_element_type=jnp.float32) + b1_ref[...]
    h = jnp.maximum(h, 0.0)
    h1_ref[...] = h

    # Mask batch-padding rows so they do not pollute the BN statistics.
    row = lax.broadcasted_iota(jnp.int32, (tb, 1), 0) + bt * tb
    hm = jnp.where(row < n_rows, h, 0.0)
    s1_ref[...] += jnp.sum(hm, axis=0, keepdims=True)
    ss1_ref[...] += jnp.sum(hm * hm, axis=0, keepdims=True)


# ---------------------------------------------------------------------------
# Stage 2:  h1n = BN1(h1) (fused scale/shift);  h2 = relu(h1n @ W2 + b2);  stats for BN2.
# ---------------------------------------------------------------------------
def _stage2_kernel(h1_ref, s1_ref, ss1_ref, g1_ref, be1_ref, w2_ref, b2_ref,
                   h2_ref, s2_ref, ss2_ref, *, n_rows, tb):
    bt = pl.program_id(0)

    @pl.when(bt == 0)
    def _init():
        s2_ref[...] = jnp.zeros_like(s2_ref)
        ss2_ref[...] = jnp.zeros_like(ss2_ref)

    inv_n = jnp.float32(1.0 / n_rows)
    mu = s1_ref[...] * inv_n
    var = jnp.maximum(ss1_ref[...] * inv_n - mu * mu, 0.0)
    scale = g1_ref[...] * lax.rsqrt(var + EPS)   # fused BN affine: h*scale + shift
    shift = be1_ref[...] - mu * scale

    h1n = h1_ref[...] * scale + shift
    h2 = jnp.dot(h1n.astype(jnp.bfloat16), w2_ref[...],
                 preferred_element_type=jnp.float32) + b2_ref[...]
    h2 = jnp.maximum(h2, 0.0)
    h2_ref[...] = h2

    row = lax.broadcasted_iota(jnp.int32, (tb, 1), 0) + bt * tb
    hm = jnp.where(row < n_rows, h2, 0.0)
    s2_ref[...] += jnp.sum(hm, axis=0, keepdims=True)
    ss2_ref[...] += jnp.sum(hm * hm, axis=0, keepdims=True)


# ---------------------------------------------------------------------------
# Stage 3:  out = BN2(h2) + skip(x).   No cross-tile dependency -> "parallel".
# ---------------------------------------------------------------------------
def _stage3_kernel(x_ref, h2_ref, s2_ref, ss2_ref, g2_ref, be2_ref, ws_ref, bs_ref,
                   o_ref, *, n_rows, linear_skip):
    inv_n = jnp.float32(1.0 / n_rows)
    mu = s2_ref[...] * inv_n
    var = jnp.maximum(ss2_ref[...] * inv_n - mu * mu, 0.0)
    scale = g2_ref[...] * lax.rsqrt(var + EPS)
    shift = be2_ref[...] - mu * scale

    if linear_skip:
        skip = jnp.dot(x_ref[...].astype(jnp.bfloat16), ws_ref[...],
                       preferred_element_type=jnp.float32) + bs_ref[...]
    else:
        skip = x_ref[...]   # identity skip (in_channels == out_channels)

    o_ref[...] = (h2_ref[...] * scale + shift + skip).astype(o_ref.dtype)


# ---------------------------------------------------------------------------
# Wrapper
# ---------------------------------------------------------------------------
@functools.partial(jax.jit, static_argnames=("block_b",))
def residual_block(x, params, *, block_b=256):
    """Forward pass of ResidualBlock.  x: (B, Cin) float32 -> (B, Cout) float32."""
    B, Cin = x.shape
    Cout = params["w1"].shape[1]
    linear_skip = "ws" in params
    if not linear_skip:
        assert Cin == Cout, "identity skip requires in_channels == out_channels"
    assert block_b % SUBLANE == 0

    cin_p = _round_up(Cin, LANE)
    cout_p = _round_up(Cout, LANE)
    tb = min(block_b, _round_up(B, SUBLANE))
    b_p = _round_up(B, tb)
    nbt = b_p // tb

    f32, bf16 = jnp.float32, jnp.bfloat16

    # Zero padding is exact: padded in-features multiply zero weights, padded out-features
    # stay exactly zero through ReLU/BN/skip and are sliced off at the end.
    xp = jnp.zeros((b_p, cin_p), f32).at[:B, :Cin].set(x.astype(f32))

    def pad_mat(w, rows_p):
        r, c = w.shape
        return jnp.zeros((rows_p, cout_p), bf16).at[:r, :c].set(w.astype(bf16))

    def pad_vec(v):
        return jnp.zeros((1, cout_p), f32).at[:, :Cout].set(
            jnp.asarray(v, f32).reshape(1, Cout))

    w1 = pad_mat(params["w1"], cin_p)
    b1 = pad_vec(params["b1"])
    g1 = pad_vec(params["g1"])
    be1 = pad_vec(params["be1"])
    w2 = pad_mat(params["w2"], cout_p)
    b2 = pad_vec(params["b2"])
    g2 = pad_vec(params["g2"])
    be2 = pad_vec(params["be2"])
    if linear_skip:
        ws = pad_mat(params["ws"], cin_p)
        bs = pad_vec(params["bs"])
    else:
        ws = jnp.zeros((cin_p, cout_p), bf16)   # unused in kernel (trace-time branch)
        bs = jnp.zeros((1, cout_p), f32)        # unused

    row_in = lambda c: pl.BlockSpec((tb, c), lambda i: (i, 0))          # per-tile rows
    const2d = lambda r, c: pl.BlockSpec((r, c), lambda i: (0, 0))       # VMEM-resident
    vec = const2d(1, cout_p)

    cp_arb = pltpu.CompilerParams(dimension_semantics=("arbitrary",),
                                  vmem_limit_bytes=32 * 1024 * 1024)
    cp_par = pltpu.CompilerParams(dimension_semantics=("parallel",),
                                  vmem_limit_bytes=32 * 1024 * 1024)

    # ---- stage 1: Linear1 + ReLU + BN1 stats ----
    h1, s1, ss1 = pl.pallas_call(
        functools.partial(_stage1_kernel, n_rows=B, tb=tb),
        grid=(nbt,),
        in_specs=[row_in(cin_p), const2d(cin_p, cout_p), vec],
        out_specs=[row_in(cout_p), vec, vec],
        out_shape=[jax.ShapeDtypeStruct((b_p, cout_p), f32),
                   jax.ShapeDtypeStruct((1, cout_p), f32),
                   jax.ShapeDtypeStruct((1, cout_p), f32)],
        compiler_params=cp_arb,
        cost_estimate=pl.CostEstimate(
            flops=2 * b_p * cin_p * cout_p, transcendentals=0,
            bytes_accessed=4 * b_p * (cin_p + cout_p) + 2 * cin_p * cout_p),
    )(xp, w1, b1)

    # ---- stage 2: BN1 (fused) + Linear2 + ReLU + BN2 stats ----
    h2, s2, ss2 = pl.pallas_call(
        functools.partial(_stage2_kernel, n_rows=B, tb=tb),
        grid=(nbt,),
        in_specs=[row_in(cout_p), vec, vec, vec, vec,
                  const2d(cout_p, cout_p), vec],
        out_specs=[row_in(cout_p), vec, vec],
        out_shape=[jax.ShapeDtypeStruct((b_p, cout_p), f32),
                   jax.ShapeDtypeStruct((1, cout_p), f32),
                   jax.ShapeDtypeStruct((1, cout_p), f32)],
        compiler_params=cp_arb,
        cost_estimate=pl.CostEstimate(
            flops=2 * b_p * cout_p * cout_p, transcendentals=nbt * cout_p,
            bytes_accessed=8 * b_p * cout_p + 2 * cout_p * cout_p),
    )(h1, s1, ss1, g1, be1, w2, b2)

    # ---- stage 3: BN2 (fused) + skip + add ----
    out = pl.pallas_call(
        functools.partial(_stage3_kernel, n_rows=B, linear_skip=linear_skip),
        grid=(nbt,),
        in_specs=[row_in(cin_p), row_in(cout_p), vec, vec, vec, vec,
                  const2d(cin_p, cout_p), vec],
        out_specs=row_in(cout_p),
        out_shape=jax.ShapeDtypeStruct((b_p, cout_p), f32),
        compiler_params=cp_par,
        cost_estimate=pl.CostEstimate(
            flops=(2 * b_p * cin_p * cout_p if linear_skip else 0) + 2 * b_p * cout_p,
            transcendentals=nbt * cout_p,
            bytes_accessed=4 * b_p * (cin_p + 2 * cout_p) + 2 * cin_p * cout_p),
    )(xp, h2, s2, ss2, g2, be2, ws, bs)

    return out[:B, :Cout]


# ---------------------------------------------------------------------------
# Parameter init (mirrors PyTorch shapes; Linear weights pre-transposed to (in, out)).
# ---------------------------------------------------------------------------
def init_params(key, in_channels, out_channels):
    k1, k2, k3, k4, k5, k6 = jax.random.split(key, 6)
    s_in = in_channels ** -0.5
    s_out = out_channels ** -0.5
    p = {
        "w1": jax.random.uniform(k1, (in_channels, out_channels), jnp.float32, -s_in, s_in),
        "b1": jax.random.uniform(k2, (1, out_channels), jnp.float32, -s_in, s_in),
        "g1": jnp.ones((1, out_channels), jnp.float32),
        "be1": jnp.zeros((1, out_channels), jnp.float32),
        "w2": jax.random.uniform(k3, (out_channels, out_channels), jnp.float32, -s_out, s_out),
        "b2": jax.random.uniform(k4, (1, out_channels), jnp.float32, -s_out, s_out),
        "g2": jnp.ones((1, out_channels), jnp.float32),
        "be2": jnp.zeros((1, out_channels), jnp.float32),
    }
    if in_channels != out_channels:   # skip = nn.Linear, else nn.Identity
        p["ws"] = jax.random.uniform(k5, (in_channels, out_channels), jnp.float32, -s_in, s_in)
        p["bs"] = jax.random.uniform(k6, (1, out_channels), jnp.float32, -s_in, s_in)
    return p


# ---------------------------------------------------------------------------
# References
# ---------------------------------------------------------------------------
def _reference_f32(x, p):
    """Pure-f32 JAX mirror of the PyTorch forward (training-mode BN)."""
    def bn(h, g, b):
        mu = h.mean(0, keepdims=True)
        var = ((h - mu) ** 2).mean(0, keepdims=True)
        return (h - mu) / jnp.sqrt(var + EPS) * g + b
    h = bn(jnp.maximum(x @ p["w1"] + p["b1"], 0.0), p["g1"], p["be1"])
    h2 = bn(jnp.maximum(h @ p["w2"] + p["b2"], 0.0), p["g2"], p["be2"])
    skip = x @ p["ws"] + p["bs"] if "ws" in p else x
    return h2 + skip


def _reference_bf16(x, p):
    """Reference mirroring the kernel's bf16-matmul / fused-BN arithmetic."""
    n = x.shape[0]
    def dot(a, w):
        return jnp.dot(a.astype(jnp.bfloat16), w.astype(jnp.bfloat16),
                       preferred_element_type=jnp.float32)
    def bn(h, g, b):
        mu = h.sum(0, keepdims=True) / n
        var = jnp.maximum((h * h).sum(0, keepdims=True) / n - mu * mu, 0.0)
        scale = g * lax.rsqrt(var + EPS)
        return h * scale + (b - mu * scale)
    h = bn(jnp.maximum(dot(x, p["w1"]) + p["b1"], 0.0), p["g1"], p["be1"])
    h2 = bn(jnp.maximum(dot(h, p["w2"]) + p["b2"], 0.0), p["g2"], p["be2"])
    skip = (dot(x, p["ws"]) + p["bs"]) if "ws" in p else x
    return h2 + skip


if __name__ == "__main__":
    key = jax.random.PRNGKey(0)
    k1, k2, k3, k4 = jax.random.split(key, 4)

    # Case 1: in_channels != out_channels (Linear skip).  Shapes deliberately unaligned
    # to exercise feature padding and multi-tile batch masking (block_b=64 -> 4 tiles).
    B, Cin, Cout = 200, 96, 192
    x = jax.random.normal(k1, (B, Cin), jnp.float32)
    params = init_params(k2, Cin, Cout)
    out = jax.block_until_ready(residual_block(x, params, block_b=64))
    assert out.shape == (B, Cout), out.shape

    ref_b = _reference_bf16(x, params)
    ref_f = _reference_f32(x, params)
    err_b = float(jnp.max(jnp.abs(out - ref_b)))
    rel_f = float(jnp.linalg.norm(out - ref_f) / jnp.linalg.norm(ref_f))
    assert err_b < 5e-3, ("mismatch vs bf16-matched reference", err_b)
    assert rel_f < 2e-2, ("mismatch vs f32 reference", rel_f)

    # Case 2: in_channels == out_channels (identity skip).
    B2, C2 = 64, 128
    x2 = jax.random.normal(k3, (B2, C2), jnp.float32)
    params2 = init_params(k4, C2, C2)
    out2 = jax.block_until_ready(residual_block(x2, params2))
    assert out2.shape == (B2, C2), out2.shape
    err2 = float(jnp.max(jnp.abs(out2 - _reference_bf16(x2, params2))))
    assert err2 < 5e-3, err2

    print("KERNEL_OK")
</pallas_src>

<mosaic_0001>
module attributes {stable_mosaic.version = 11 : i64} {
  func.func @_stage1_kernel(%arg0: i32, %arg1: memref<64x128xf32, #tpu.memory_space<vmem>>, %arg2: memref<128x256xbf16, #tpu.memory_space<vmem>>, %arg3: memref<1x256xf32, #tpu.memory_space<vmem>>, %arg4: memref<64x256xf32, #tpu.memory_space<vmem>>, %arg5: memref<1x256xf32, #tpu.memory_space<vmem>>, %arg6: memref<1x256xf32, #tpu.memory_space<vmem>>) attributes {dimension_semantics = [#tpu.dimension_semantics<arbitrary>], iteration_bounds = array<i64: 4>, scalar_prefetch = 0 : i64, scratch_operands = 0 : i64, tpu.core_type = #tpu.core_type<tc>, window_params = [{transform_indices = @transform_0, window_bounds = array<i64: 64, 128>}, {pipeline_mode = #tpu.pipeline_mode<synchronous>, transform_indices = @transform_1, window_bounds = array<i64: 128, 256>}, {pipeline_mode = #tpu.pipeline_mode<synchronous>, transform_indices = @transform_2, window_bounds = array<i64: 1, 256>}, {transform_indices = @transform_3, window_bounds = array<i64: 64, 256>}, {pipeline_mode = #tpu.pipeline_mode<synchronous>, transform_indices = @transform_4, window_bounds = array<i64: 1, 256>}, {pipeline_mode = #tpu.pipeline_mode<synchronous>, transform_indices = @transform_5, window_bounds = array<i64: 1, 256>}]} {
    %c0_i32 = arith.constant 0 : i32
    %0 = arith.cmpi eq, %arg0, %c0_i32 : i32
    %1 = arith.extui %0 : i1 to i32
    %c0_i32_0 = arith.constant 0 : i32
    %2 = arith.cmpi ne, %1, %c0_i32_0 : i32
    scf.if %2 {
      %cst_20 = arith.constant 0.000000e+00 : f32
      %34 = vector.broadcast %cst_20 : f32 to vector<1x256xf32>
      %c0_21 = arith.constant 0 : index
      %c0_22 = arith.constant 0 : index
      %35 = vector.load %arg5[%c0_21, %c0_22] : memref<1x256xf32, #tpu.memory_space<vmem>>, vector<1x256xf32>
      tpu.vector_store %arg5[%c0_21, %c0_22], %34 {strides = array<i32>} : memref<1x256xf32, #tpu.memory_space<vmem>>, vector<1x256xf32>,
      %cst_23 = arith.constant 0.000000e+00 : f32
      %36 = vector.broadcast %cst_23 : f32 to vector<1x256xf32>
      %c0_24 = arith.constant 0 : index
      %c0_25 = arith.constant 0 : index
      %37 = vector.load %arg6[%c0_24, %c0_25] : memref<1x256xf32, #tpu.memory_space<vmem>>, vector<1x256xf32>
      tpu.vector_store %arg6[%c0_24, %c0_25], %36 {strides = array<i32>} : memref<1x256xf32, #tpu.memory_space<vmem>>, vector<1x256xf32>,
    } else {
    }
    %c0 = arith.constant 0 : index
    %c0_1 = arith.constant 0 : index
    %3 = vector.load %arg1[%c0, %c0_1] : memref<64x128xf32, #tpu.memory_space<vmem>>, vector<64x128xf32>
    %4 = arith.truncf %3 : vector<64x128xf32> to vector<64x128xbf16>
    %c0_2 = arith.constant 0 : index
    %c0_3 = arith.constant 0 : index
    %5 = vector.load %arg2[%c0_2, %c0_3] : memref<128x256xbf16, #tpu.memory_space<vmem>>, vector<128x256xbf16>
    %cst = arith.constant dense<0.000000e+00> : vector<64x256xf32>
    %6 = tpu.matmul %4, %5, %cst {dimension_numbers = #tpu.dot_dimension_numbers<[1], [0], [0], [1], [0, 0, 1, 1], [], []>} : vector<64x128xbf16>, vector<128x256xbf16>, vector<64x256xf32> -> vector<64x256xf32>
    %c0_4 = arith.constant 0 : index
    %c0_5 = arith.constant 0 : index
    %7 = vector.load %arg3[%c0_4, %c0_5] : memref<1x256xf32, #tpu.memory_space<vmem>>, vector<1x256xf32>
    %8 = vector.broadcast %7 : vector<1x256xf32> to vector<64x256xf32>
    %9 = arith.addf %6, %8 : vector<64x256xf32>
    %cst_6 = arith.constant 0.000000e+00 : f32
    %10 = vector.broadcast %cst_6 : f32 to vector<64x256xf32>
    %11 = arith.maximumf %9, %10 : vector<64x256xf32>
    %c0_7 = arith.constant 0 : index
    %c0_8 = arith.constant 0 : index
    %12 = vector.load %arg4[%c0_7, %c0_8] : memref<64x256xf32, #tpu.memory_space<vmem>>, vector<64x256xf32>
    tpu.vector_store %arg4[%c0_7, %c0_8], %11 {strides = array<i32>} : memref<64x256xf32, #tpu.memory_space<vmem>>, vector<64x256xf32>,
    %13 = tpu.iota {dimensions = array<i32: 0>} : vector<64x1xi32>
    %c64_i32 = arith.constant 64 : i32
    %14 = arith.muli %arg0, %c64_i32 : i32
    %15 = vector.broadcast %14 : i32 to vector<64x1xi32>
    %16 = arith.addi %13, %15 : vector<64x1xi32>
    %c200_i32 = arith.constant 200 : i32
    %17 = vector.broadcast %c200_i32 : i32 to vector<64x1xi32>
    %18 = arith.cmpi slt, %16, %17 : vector<64x1xi32>
    %cst_9 = arith.constant 0.000000e+00 : f32
    %19 = vector.shape_cast %18 : vector<64x1xi1> to vector<64x1xi1>
    %20 = vector.broadcast %19 : vector<64x1xi1> to vector<64x256xi1>
    %21 = vector.broadcast %cst_9 : f32 to vector<64x256xf32>
    %22 = arith.select %20, %11, %21 : vector<64x256xi1>, vector<64x256xf32>
    %c0_10 = arith.constant 0 : index
    %c0_11 = arith.constant 0 : index
    %23 = vector.load %arg5[%c0_10, %c0_11] : memref<1x256xf32, #tpu.memory_space<vmem>>, vector<1x256xf32>
    %cst_12 = arith.constant dense<0.000000e+00> : vector<256xf32>
    %24 = vector.multi_reduction <add>, %22, %cst_12 [0] : vector<64x256xf32> to vector<256xf32>
    %25 = vector.shape_cast %24 : vector<256xf32> to vector<1x256xf32>
    %26 = arith.addf %23, %25 : vector<1x256xf32>
    %c0_13 = arith.constant 0 : index
    %c0_14 = arith.constant 0 : index
    %27 = vector.load %arg5[%c0_13, %c0_14] : memref<1x256xf32, #tpu.memory_space<vmem>>, vector<1x256xf32>
    tpu.vector_store %arg5[%c0_13, %c0_14], %26 {strides = array<i32>} : memref<1x256xf32, #tpu.memory_space<vmem>>, vector<1x256xf32>,
    %c0_15 = arith.constant 0 : index
    %c0_16 = arith.constant 0 : index
    %28 = vector.load %arg6[%c0_15, %c0_16] : memref<1x256xf32, #tpu.memory_space<vmem>>, vector<1x256xf32>
    %29 = arith.mulf %22, %22 : vector<64x256xf32>
    %cst_17 = arith.constant dense<0.000000e+00> : vector<256xf32>
    %30 = vector.multi_reduction <add>, %29, %cst_17 [0] : vector<64x256xf32> to vector<256xf32>
    %31 = vector.shape_cast %30 : vector<256xf32> to vector<1x256xf32>
    %32 = arith.addf %28, %31 : vector<1x256xf32>
    %c0_18 = arith.constant 0 : index
    %c0_19 = arith.constant 0 : index
    %33 = vector.load %arg6[%c0_18, %c0_19] : memref<1x256xf32, #tpu.memory_space<vmem>>, vector<1x256xf32>
    tpu.vector_store %arg6[%c0_18, %c0_19], %32 {strides = array<i32>} : memref<1x256xf32, #tpu.memory_space<vmem>>, vector<1x256xf32>,
    return
  }
  func.func @transform_0(%arg0: i32) -> (i32, i32) {
    %c0_i32 = arith.constant 0 : i32
    %c0_i32_0 = arith.constant 0 : i32
    return %arg0, %c0_i32 : i32, i32
  }
  func.func @transform_1(%arg0: i32) -> (i32, i32) {
    %c0_i32 = arith.constant 0 : i32
    %c0_i32_0 = arith.constant 0 : i32
    %c0_i32_1 = arith.constant 0 : i32
    return %c0_i32, %c0_i32_0 : i32, i32
  }
  func.func @transform_2(%arg0: i32) -> (i32, i32) {
    %c0_i32 = arith.constant 0 : i32
    %c0_i32_0 = arith.constant 0 : i32
    %c0_i32_1 = arith.constant 0 : i32
    return %c0_i32, %c0_i32_0 : i32, i32
  }
  func.func @transform_3(%arg0: i32) -> (i32, i32) {
    %c0_i32 = arith.constant 0 : i32
    %c0_i32_0 = arith.constant 0 : i32
    return %arg0, %c0_i32 : i32, i32
  }
  func.func @transform_4(%arg0: i32) -> (i32, i32) {
    %c0_i32 = arith.constant 0 : i32
    %c0_i32_0 = arith.constant 0 : i32
    %c0_i32_1 = arith.constant 0 : i32
    return %c0_i32, %c0_i32_0 : i32, i32
  }
  func.func @transform_5(%arg0: i32) -> (i32, i32) {
    %c0_i32 = arith.constant 0 : i32
    %c0_i32_0 = arith.constant 0 : i32
    %c0_i32_1 = arith.constant 0 : i32
    return %c0_i32, %c0_i32_0 : i32, i32
  }
}

module attributes {stable_mosaic.version = 11 : i64} {
  func.func @_stage2_kernel(%arg0: i32, %arg1: memref<64x256xf32, #tpu.memory_space<vmem>>, %arg2: memref<1x256xf32, #tpu.memory_space<vmem>>, %arg3: memref<1x256xf32, #tpu.memory_space<vmem>>, %arg4: memref<1x256xf32, #tpu.memory_space<vmem>>, %arg5: memref<1x256xf32, #tpu.memory_space<vmem>>, %arg6: memref<256x256xbf16, #tpu.memory_space<vmem>>, %arg7: memref<1x256xf32, #tpu.memory_space<vmem>>, %arg8: memref<64x256xf32, #tpu.memory_space<vmem>>, %arg9: memref<1x256xf32, #tpu.memory_space<vmem>>, %arg10: memref<1x256xf32, #tpu.memory_space<vmem>>) attributes {dimension_semantics = [#tpu.dimension_semantics<arbitrary>], iteration_bounds = array<i64: 4>, scalar_prefetch = 0 : i64, scratch_operands = 0 : i64, tpu.core_type = #tpu.core_type<tc>, window_params = [{transform_indices = @transform_0, window_bounds = array<i64: 64, 256>}, {pipeline_mode = #tpu.pipeline_mode<synchronous>, transform_indices = @transform_1, window_bounds = array<i64: 1, 256>}, {pipeline_mode = #tpu.pipeline_mode<synchronous>, transform_indices = @transform_2, window_bounds = array<i64: 1, 256>}, {pipeline_mode = #tpu.pipeline_mode<synchronous>, transform_indices = @transform_3, window_bounds = array<i64: 1, 256>}, {pipeline_mode = #tpu.pipeline_mode<synchronous>, transform_indices = @transform_4, window_bounds = array<i64: 1, 256>}, {pipeline_mode = #tpu.pipeline_mode<synchronous>, transform_indices = @transform_5, window_bounds = array<i64: 256, 256>}, {pipeline_mode = #tpu.pipeline_mode<synchronous>, transform_indices = @transform_6, window_bounds = array<i64: 1, 256>}, {transform_indices = @transform_7, window_bounds = array<i64: 64, 256>}, {pipeline_mode = #tpu.pipeline_mode<synchronous>, transform_indices = @transform_8, window_bounds = array<i64: 1, 256>}, {pipeline_mode = #tpu.pipeline_mode<synchronous>, transform_indices = @transform_9, window_bounds = array<i64: 1, 256>}]} {
    %c0_i32 = arith.constant 0 : i32
    %0 = arith.cmpi eq, %arg0, %c0_i32 : i32
    %1 = arith.extui %0 : i1 to i32
    %c0_i32_0 = arith.constant 0 : i32
    %2 = arith.cmpi ne, %1, %c0_i32_0 : i32
    scf.if %2 {
      %cst_32 = arith.constant 0.000000e+00 : f32
      %56 = vector.broadcast %cst_32 : f32 to vector<1x256xf32>
      %c0_33 = arith.constant 0 : index
      %c0_34 = arith.constant 0 : index
      %57 = vector.load %arg9[%c0_33, %c0_34] : memref<1x256xf32, #tpu.memory_space<vmem>>, vector<1x256xf32>
      tpu.vector_store %arg9[%c0_33, %c0_34], %56 {strides = array<i32>} : memref<1x256xf32, #tpu.memory_space<vmem>>, vector<1x256xf32>,
      %cst_35 = arith.constant 0.000000e+00 : f32
      %58 = vector.broadcast %cst_35 : f32 to vector<1x256xf32>
      %c0_36 = arith.constant 0 : index
      %c0_37 = arith.constant 0 : index
      %59 = vector.load %arg10[%c0_36, %c0_37] : memref<1x256xf32, #tpu.memory_space<vmem>>, vector<1x256xf32>
      tpu.vector_store %arg10[%c0_36, %c0_37], %58 {strides = array<i32>} : memref<1x256xf32, #tpu.memory_space<vmem>>, vector<1x256xf32>,
    } else {
    }
    %c0 = arith.constant 0 : index
    %c0_1 = arith.constant 0 : index
    %3 = vector.load %arg2[%c0, %c0_1] : memref<1x256xf32, #tpu.memory_space<vmem>>, vector<1x256xf32>
    %cst = arith.constant 5.000000e-03 : f32
    %4 = vector.broadcast %cst : f32 to vector<1x256xf32>
    %5 = arith.mulf %3, %4 : vector<1x256xf32>
    %c0_2 = arith.constant 0 : index
    %c0_3 = arith.constant 0 : index
    %6 = vector.load %arg3[%c0_2, %c0_3] : memref<1x256xf32, #tpu.memory_space<vmem>>, vector<1x256xf32>
    %cst_4 = arith.constant 5.000000e-03 : f32
    %7 = vector.broadcast %cst_4 : f32 to vector<1x256xf32>
    %8 = arith.mulf %6, %7 : vector<1x256xf32>
    %9 = arith.mulf %5, %5 : vector<1x256xf32>
    %10 = arith.subf %8, %9 : vector<1x256xf32>
    %cst_5 = arith.constant 0.000000e+00 : f32
    %11 = vector.broadcast %cst_5 : f32 to vector<1x256xf32>
    %12 = arith.maximumf %10, %11 : vector<1x256xf32>
    %c0_6 = arith.constant 0 : index
    %c0_7 = arith.constant 0 : index
    %13 = vector.load %arg4[%c0_6, %c0_7] : memref<1x256xf32, #tpu.memory_space<vmem>>, vector<1x256xf32>
    %cst_8 = arith.constant 9.99999974E-6 : f32
    %14 = vector.broadcast %cst_8 : f32 to vector<1x256xf32>
    %15 = arith.addf %12, %14 : vector<1x256xf32>
    %16 = math.rsqrt %15 : vector<1x256xf32>
    %17 = arith.mulf %13, %16 : vector<1x256xf32>
    %c0_9 = arith.constant 0 : index
    %c0_10 = arith.constant 0 : index
    %18 = vector.load %arg5[%c0_9, %c0_10] : memref<1x256xf32, #tpu.memory_space<vmem>>, vector<1x256xf32>
    %19 = arith.mulf %5, %17 : vector<1x256xf32>
    %20 = arith.subf %18, %19 : vector<1x256xf32>
    %c0_11 = arith.constant 0 : index
    %c0_12 = arith.constant 0 : index
    %21 = vector.load %arg1[%c0_11, %c0_12] : memref<64x256xf32, #tpu.memory_space<vmem>>, vector<64x256xf32>
    %22 = vector.broadcast %17 : vector<1x256xf32> to vector<64x256xf32>
    %23 = arith.mulf %21, %22 : vector<64x256xf32>
    %24 = vector.broadcast %20 : vector<1x256xf32> to vector<64x256xf32>
    %25 = arith.addf %23, %24 : vector<64x256xf32>
    %26 = arith.truncf %25 : vector<64x256xf32> to vector<64x256xbf16>
    %c0_13 = arith.constant 0 : index
    %c0_14 = arith.constant 0 : index
    %27 = vector.load %arg6[%c0_13, %c0_14] : memref<256x256xbf16, #tpu.memory_space<vmem>>, vector<256x256xbf16>
    %cst_15 = arith.constant dense<0.000000e+00> : vector<64x256xf32>
    %28 = tpu.matmul %26, %27, %cst_15 {dimension_numbers = #tpu.dot_dimension_numbers<[1], [0], [0], [1], [0, 0, 1, 1], [], []>} : vector<64x256xbf16>, vector<256x256xbf16>, vector<64x256xf32> -> vector<64x256xf32>
    %c0_16 = arith.constant 0 : index
    %c0_17 = arith.constant 0 : index
    %29 = vector.load %arg7[%c0_16, %c0_17] : memref<1x256xf32, #tpu.memory_space<vmem>>, vector<1x256xf32>
    %30 = vector.broadcast %29 : vector<1x256xf32> to vector<64x256xf32>
    %31 = arith.addf %28, %30 : vector<64x256xf32>
    %cst_18 = arith.constant 0.000000e+00 : f32
    %32 = vector.broadcast %cst_18 : f32 to vector<64x256xf32>
    %33 = arith.maximumf %31, %32 : vector<64x256xf32>
    %c0_19 = arith.constant 0 : index
    %c0_20 = arith.constant 0 : index
    %34 = vector.load %arg8[%c0_19, %c0_20] : memref<64x256xf32, #tpu.memory_space<vmem>>, vector<64x256xf32>
    tpu.vector_store %arg8[%c0_19, %c0_20], %33 {strides = array<i32>} : memref<64x256xf32, #tpu.memory_space<vmem>>, vector<64x256xf32>,
    %35 = tpu.iota {dimensions = array<i32: 0>} : vector<64x1xi32>
    %c64_i32 = arith.constant 64 : i32
    %36 = arith.muli %arg0, %c64_i32 : i32
    %37 = vector.broadcast %36 : i32 to vector<64x1xi32>
    %38 = arith.addi %35, %37 : vector<64x1xi32>
    %c200_i32 = arith.constant 200 : i32
    %39 = vector.broadcast %c200_i32 : i32 to vector<64x1xi32>
    %40 = arith.cmpi slt, %38, %39 : vector<64x1xi32>
    %cst_21 = arith.constant 0.000000e+00 : f32
    %41 = vector.shape_cast %40 : vector<64x1xi1> to vector<64x1xi1>
    %42 = vector.broadcast %41 : vector<64x1xi1> to vector<64x256xi1>
    %43 = vector.broadcast %cst_21 : f32 to vector<64x256xf32>
    %44 = arith.select %42, %33, %43 : vector<64x256xi1>, vector<64x256xf32>
    %c0_22 = arith.constant 0 : index
    %c0_23 = arith.constant 0 : index
    %45 = vector.load %arg9[%c0_22, %c0_23] : memref<1x256xf32, #tpu.memory_space<vmem>>, vector<1x256xf32>
    %cst_24 = arith.constant dense<0.000000e+00> : vector<256xf32>
    %46 = vector.multi_reduction <add>, %44, %cst_24 [0] : vector<64x256xf32> to vector<256xf32>
    %47 = vector.shape_cast %46 : vector<256xf32> to vector<1x256xf32>
    %48 = arith.addf %45, %47 : vector<1x256xf32>
    %c0_25 = arith.constant 0 : index
    %c0_26 = arith.constant 0 : index
    %49 = vector.load %arg9[%c0_25, %c0_26] : memref<1x256xf32, #tpu.memory_space<vmem>>, vector<1x256xf32>
    tpu.vector_store %arg9[%c0_25, %c0_26], %48 {strides = array<i32>} : memref<1x256xf32, #tpu.memory_space<vmem>>, vector<1x256xf32>,
    %c0_27 = arith.constant 0 : index
    %c0_28 = arith.constant 0 : index
    %50 = vector.load %arg10[%c0_27, %c0_28] : memref<1x256xf32, #tpu.memory_space<vmem>>, vector<1x256xf32>
    %51 = arith.mulf %44, %44 : vector<64x256xf32>
    %cst_29 = arith.constant dense<0.000000e+00> : vector<256xf32>
    %52 = vector.multi_reduction <add>, %51, %cst_29 [0] : vector<64x256xf32> to vector<256xf32>
    %53 = vector.shape_cast %52 : vector<256xf32> to vector<1x256xf32>
    %54 = arith.addf %50, %53 : vector<1x256xf32>
    %c0_30 = arith.constant 0 : index
    %c0_31 = arith.constant 0 : index
    %55 = vector.load %arg10[%c0_30, %c0_31] : memref<1x256xf32, #tpu.memory_space<vmem>>, vector<1x256xf32>
    tpu.vector_store %arg10[%c0_30, %c0_31], %54 {strides = array<i32>} : memref<1x256xf32, #tpu.memory_space<vmem>>, vector<1x256xf32>,
    return
  }
  func.func @transform_0(%arg0: i32) -> (i32, i32) {
    %c0_i32 = arith.constant 0 : i32
    %c0_i32_0 = arith.constant 0 : i32
    return %arg0, %c0_i32 : i32, i32
  }
  func.func @transform_1(%arg0: i32) -> (i32, i32) {
    %c0_i32 = arith.constant 0 : i32
    %c0_i32_0 = arith.constant 0 : i32
    %c0_i32_1 = arith.constant 0 : i32
    return %c0_i32, %c0_i32_0 : i32, i32
  }
  func.func @transform_2(%arg0: i32) -> (i32, i32) {
    %c0_i32 = arith.constant 0 : i32
    %c0_i32_0 = arith.constant 0 : i32
    %c0_i32_1 = arith.constant 0 : i32
    return %c0_i32, %c0_i32_0 : i32, i32
  }
  func.func @transform_3(%arg0: i32) -> (i32, i32) {
    %c0_i32 = arith.constant 0 : i32
    %c0_i32_0 = arith.constant 0 : i32
    %c0_i32_1 = arith.constant 0 : i32
    return %c0_i32, %c0_i32_0 : i32, i32
  }
  func.func @transform_4(%arg0: i32) -> (i32, i32) {
    %c0_i32 = arith.constant 0 : i32
    %c0_i32_0 = arith.constant 0 : i32
    %c0_i32_1 = arith.constant 0 : i32
    return %c0_i32, %c0_i32_0 : i32, i32
  }
  func.func @transform_5(%arg0: i32) -> (i32, i32) {
    %c0_i32 = arith.constant 0 : i32
    %c0_i32_0 = arith.constant 0 : i32
    %c0_i32_1 = arith.constant 0 : i32
    return %c0_i32, %c0_i32_0 : i32, i32
  }
  func.func @transform_6(%arg0: i32) -> (i32, i32) {
    %c0_i32 = arith.constant 0 : i32
    %c0_i32_0 = arith.constant 0 : i32
    %c0_i32_1 = arith.constant 0 : i32
    return %c0_i32, %c0_i32_0 : i32, i32
  }
  func.func @transform_7(%arg0: i32) -> (i32, i32) {
    %c0_i32 = arith.constant 0 : i32
    %c0_i32_0 = arith.constant 0 : i32
    return %arg0, %c0_i32 : i32, i32
  }
  func.func @transform_8(%arg0: i32) -> (i32, i32) {
    %c0_i32 = arith.constant 0 : i32
    %c0_i32_0 = arith.constant 0 : i32
    %c0_i32_1 = arith.constant 0 : i32
    return %c0_i32, %c0_i32_0 : i32, i32
  }
  func.func @transform_9(%arg0: i32) -> (i32, i32) {
    %c0_i32 = arith.constant 0 : i32
    %c0_i32_0 = arith.constant 0 : i32
    %c0_i32_1 = arith.constant 0 : i32
    return %c0_i32, %c0_i32_0 : i32, i32
  }
}

module attributes {stable_mosaic.version = 11 : i64} {
  func.func @_stage3_kernel(%arg0: i32, %arg1: memref<64x128xf32, #tpu.memory_space<vmem>>, %arg2: memref<64x256xf32, #tpu.memory_space<vmem>>, %arg3: memref<1x256xf32, #tpu.memory_space<vmem>>, %arg4: memref<1x256xf32, #tpu.memory_space<vmem>>, %arg5: memref<1x256xf32, #tpu.memory_space<vmem>>, %arg6: memref<1x256xf32, #tpu.memory_space<vmem>>, %arg7: memref<128x256xbf16, #tpu.memory_space<vmem>>, %arg8: memref<1x256xf32, #tpu.memory_space<vmem>>, %arg9: memref<64x256xf32, #tpu.memory_space<vmem>>) attributes {dimension_semantics = [#tpu.dimension_semantics<parallel>], iteration_bounds = array<i64: 4>, scalar_prefetch = 0 : i64, scratch_operands = 0 : i64, tpu.core_type = #tpu.core_type<tc>, window_params = [{transform_indices = @transform_0, window_bounds = array<i64: 64, 128>}, {transform_indices = @transform_1, window_bounds = array<i64: 64, 256>}, {pipeline_mode = #tpu.pipeline_mode<synchronous>, transform_indices = @transform_2, window_bounds = array<i64: 1, 256>}, {pipeline_mode = #tpu.pipeline_mode<synchronous>, transform_indices = @transform_3, window_bounds = array<i64: 1, 256>}, {pipeline_mode = #tpu.pipeline_mode<synchronous>, transform_indices = @transform_4, window_bounds = array<i64: 1, 256>}, {pipeline_mode = #tpu.pipeline_mode<synchronous>, transform_indices = @transform_5, window_bounds = array<i64: 1, 256>}, {pipeline_mode = #tpu.pipeline_mode<synchronous>, transform_indices = @transform_6, window_bounds = array<i64: 128, 256>}, {pipeline_mode = #tpu.pipeline_mode<synchronous>, transform_indices = @transform_7, window_bounds = array<i64: 1, 256>}, {transform_indices = @transform_8, window_bounds = array<i64: 64, 256>}]} {
    %c0 = arith.constant 0 : index
    %c0_0 = arith.constant 0 : index
    %0 = vector.load %arg3[%c0, %c0_0] : memref<1x256xf32, #tpu.memory_space<vmem>>, vector<1x256xf32>
    %cst = arith.constant 5.000000e-03 : f32
    %1 = vector.broadcast %cst : f32 to vector<1x256xf32>
    %2 = arith.mulf %0, %1 : vector<1x256xf32>
    %c0_1 = arith.constant 0 : index
    %c0_2 = arith.constant 0 : index
    %3 = vector.load %arg4[%c0_1, %c0_2] : memref<1x256xf32, #tpu.memory_space<vmem>>, vector<1x256xf32>
    %cst_3 = arith.constant 5.000000e-03 : f32
    %4 = vector.broadcast %cst_3 : f32 to vector<1x256xf32>
    %5 = arith.mulf %3, %4 : vector<1x256xf32>
    %6 = arith.mulf %2, %2 : vector<1x256xf32>
    %7 = arith.subf %5, %6 : vector<1x256xf32>
    %cst_4 = arith.constant 0.000000e+00 : f32
    %8 = vector.broadcast %cst_4 : f32 to vector<1x256xf32>
    %9 = arith.maximumf %7, %8 : vector<1x256xf32>
    %c0_5 = arith.constant 0 : index
    %c0_6 = arith.constant 0 : index
    %10 = vector.load %arg5[%c0_5, %c0_6] : memref<1x256xf32, #tpu.memory_space<vmem>>, vector<1x256xf32>
    %cst_7 = arith.constant 9.99999974E-6 : f32
    %11 = vector.broadcast %cst_7 : f32 to vector<1x256xf32>
    %12 = arith.addf %9, %11 : vector<1x256xf32>
    %13 = math.rsqrt %12 : vector<1x256xf32>
    %14 = arith.mulf %10, %13 : vector<1x256xf32>
    %c0_8 = arith.constant 0 : index
    %c0_9 = arith.constant 0 : index
    %15 = vector.load %arg6[%c0_8, %c0_9] : memref<1x256xf32, #tpu.memory_space<vmem>>, vector<1x256xf32>
    %16 = arith.mulf %2, %14 : vector<1x256xf32>
    %17 = arith.subf %15, %16 : vector<1x256xf32>
    %c0_10 = arith.constant 0 : index
    %c0_11 = arith.constant 0 : index
    %18 = vector.load %arg1[%c0_10, %c0_11] : memref<64x128xf32, #tpu.memory_space<vmem>>, vector<64x128xf32>
    %19 = arith.truncf %18 : vector<64x128xf32> to vector<64x128xbf16>
    %c0_12 = arith.constant 0 : index
    %c0_13 = arith.constant 0 : index
    %20 = vector.load %arg7[%c0_12, %c0_13] : memref<128x256xbf16, #tpu.memory_space<vmem>>, vector<128x256xbf16>
    %cst_14 = arith.constant dense<0.000000e+00> : vector<64x256xf32>
    %21 = tpu.matmul %19, %20, %cst_14 {dimension_numbers = #tpu.dot_dimension_numbers<[1], [0], [0], [1], [0, 0, 1, 1], [], []>} : vector<64x128xbf16>, vector<128x256xbf16>, vector<64x256xf32> -> vector<64x256xf32>
    %c0_15 = arith.constant 0 : index
    %c0_16 = arith.constant 0 : index
    %22 = vector.load %arg8[%c0_15, %c0_16] : memref<1x256xf32, #tpu.memory_space<vmem>>, vector<1x256xf32>
    %23 = vector.broadcast %22 : vector<1x256xf32> to vector<64x256xf32>
    %24 = arith.addf %21, %23 : vector<64x256xf32>
    %c0_17 = arith.constant 0 : index
    %c0_18 = arith.constant 0 : index
    %25 = vector.load %arg2[%c0_17, %c0_18] : memref<64x256xf32, #tpu.memory_space<vmem>>, vector<64x256xf32>
    %26 = vector.broadcast %14 : vector<1x256xf32> to vector<64x256xf32>
    %27 = arith.mulf %25, %26 : vector<64x256xf32>
    %28 = vector.broadcast %17 : vector<1x256xf32> to vector<64x256xf32>
    %29 = arith.addf %27, %28 : vector<64x256xf32>
    %30 = arith.addf %29, %24 : vector<64x256xf32>
    %c0_19 = arith.constant 0 : index
    %c0_20 = arith.constant 0 : index
    %31 = vector.load %arg9[%c0_19, %c0_20] : memref<64x256xf32, #tpu.memory_space<vmem>>, vector<64x256xf32>
    tpu.vector_store %arg9[%c0_19, %c0_20], %30 {strides = array<i32>} : memref<64x256xf32, #tpu.memory_space<vmem>>, vector<64x256xf32>,
    return
  }
  func.func @transform_0(%arg0: i32) -> (i32, i32) {
    %c0_i32 = arith.constant 0 : i32
    %c0_i32_0 = arith.constant 0 : i32
    return %arg0, %c0_i32 : i32, i32
  }
  func.func @transform_1(%arg0: i32) -> (i32, i32) {
    %c0_i32 = arith.constant 0 : i32
    %c0_i32_0 = arith.constant 0 : i32
    return %arg0, %c0_i32 : i32, i32
  }
  func.func @transform_2(%arg0: i32) -> (i32, i32) {
    %c0_i32 = arith.constant 0 : i32
    %c0_i32_0 = arith.constant 0 : i32
    %c0_i32_1 = arith.constant 0 : i32
    return %c0_i32, %c0_i32_0 : i32, i32
  }
  func.func @transform_3(%arg0: i32) -> (i32, i32) {
    %c0_i32 = arith.constant 0 : i32
    %c0_i32_0 = arith.constant 0 : i32
    %c0_i32_1 = arith.constant 0 : i32
    return %c0_i32, %c0_i32_0 : i32, i32
  }
  func.func @transform_4(%arg0: i32) -> (i32, i32) {
    %c0_i32 = arith.constant 0 : i32
    %c0_i32_0 = arith.constant 0 : i32
    %c0_i32_1 = arith.constant 0 : i32
    return %c0_i32, %c0_i32_0 : i32, i32
  }
  func.func @transform_5(%arg0: i32) -> (i32, i32) {
    %c0_i32 = arith.constant 0 : i32
    %c0_i32_0 = arith.constant 0 : i32
    %c0_i32_1 = arith.constant 0 : i32
    return %c0_i32, %c0_i32_0 : i32, i32
  }
  func.func @transform_6(%arg0: i32) -> (i32, i32) {
    %c0_i32 = arith.constant 0 : i32
    %c0_i32_0 = arith.constant 0 : i32
    %c0_i32_1 = arith.constant 0 : i32
    return %c0_i32, %c0_i32_0 : i32, i32
  }
  func.func @transform_7(%arg0: i32) -> (i32, i32) {
    %c0_i32 = arith.constant 0 : i32
    %c0_i32_0 = arith.constant 0 : i32
    %c0_i32_1 = arith.constant 0 : i32
    return %c0_i32, %c0_i32_0 : i32, i32
  }
  func.func @transform_8(%arg0: i32) -> (i32, i32) {
    %c0_i32 = arith.constant 0 : i32
    %c0_i32_0 = arith.constant 0 : i32
    return %arg0, %c0_i32 : i32, i32
  }
}

</mosaic_0001>

<bundles_post_ra>
// kernel: residual_block.5
= control target key start
LH: loop header
LB: loop body
LE: loop exit
PB: predicated region body
PF: predicated region fallthrough
CT: control target
= control target key end

     0   :  { %s854_s27 = smov 0   ;;  %s1045_s0 = inlined_call_operand.vmem [shape: f32[256,128], index: 0, kind: input, shape index: {}]   ;;  %s1046_s1 = inlined_call_operand.vmem [shape: f32[256,256], index: 1, kind: input, shape index: {}]   ;;  %s1047_s2 = inlined_call_operand.vmem [shape: f32[1,256], index: 2, kind: input, shape index: {}]   ;;  %s1048_s3 = inlined_call_operand.vmem [shape: f32[1,256], index: 3, kind: input, shape index: {}]   ;;  %s1049_s4 = inlined_call_operand.vmem [shape: f32[1,256], index: 4, kind: input, shape index: {}]   ;;  %s1050_s5 = inlined_call_operand.vmem [shape: f32[1,256], index: 5, kind: input, shape index: {}]   ;;  %s1051_s6 = inlined_call_operand.vmem [shape: bf16[128,256], index: 6, kind: input, shape index: {}]   ;;  %s1052_s7 = inlined_call_operand.vmem [shape: f32[1,256], index: 7, kind: input, shape index: {}]   ;;  %s1053_s8 = inlined_call_operand.vmem [shape: f32[256,256], index: 8, kind: output, shape index: {}]  }
   0x1 LB: > { %s716_s28 = sadd.s32 4294967295, %s806_s27   ;;  %p720_p0 = scmp.ge.s32.totalorder %s806_s27, 1  ;;  %s806_s27 = sphi %s854_s27, %s18_s27  }
   0x2   : > { %p275_p1 = scmp.lt.s32.totalorder %s806_s27, 5 }
   0x4   : > { %p276_p2 = pnand %p720_p0, %p275_p1 }
   0x5   : > { %v774_v0 = vld [vmem:[%s1051_s6 + $0x4] ss:$8 sps:$4 sm:$0xff] (!%p276_p2)   ;;  %v776_v1 = vld [vmem:[%s1051_s6] ss:$8 sps:$4 sm:$0xff] (!%p276_p2)   ;;  %v808_v2 = vmov (!%p276_p2), 0   ;;  %s721_s21 = sshll.u32 (!%p276_p2), %s716_s28, 3  ;;  %v381_v37 = vlaneseq (!%p276_p2) }
   0x6   : > { %279 = sbr.rel (%p276_p2) target bundleno = 267 (0x10b), region = 52  ;;  %503 = vmatprep.mubr.bf16.mxu0 (!%p276_p2), %v808_v2  ;;  %523 = vmatprep.mubr.bf16.mxu1 (!%p276_p2), %v808_v2  ;;  %v777_v3 = vld [vmem:[%s1051_s6 + $0x14] ss:$8 sps:$4 sm:$0xff] (!%p276_p2)   ;;  %v779_v4 = vld [vmem:[%s1051_s6 + $0x10] ss:$8 sps:$4 sm:$0xff] (!%p276_p2)   ;;  %p317_p3 = scmp.lt.s32.totalorder (!%p276_p2), %s721_s21, 31 }
   0x7   : > { %471 = vmatprep.subr.bf16.mxu0 (!%p276_p2), %v774_v0  ;;  %749 = vmatprep.subr.bf16.mxu1 (!%p276_p2), %v774_v0  ;;  %v780_v5 = vld [vmem:[%s1051_s6 + $0x24] ss:$8 sps:$4 sm:$0xff] (!%p276_p2)   ;;  %v782_v6 = vld [vmem:[%s1051_s6 + $0x20] ss:$8 sps:$4 sm:$0xff] (!%p276_p2)   ;;  %v783_v7 = vld [vmem:[%s1051_s6 + $0x34] ss:$8 sps:$4 sm:$0xff] (!%p276_p2)  }
   0x8   : > { %472 = vmatpush1.bf16.msra.mxu0 (!%p276_p2), %v776_v1  ;;  %757 = vmatpush1.bf16.msra.mxu1 (!%p276_p2), %v776_v1  ;;  %v785_v8 = vld [vmem:[%s1051_s6 + $0x30] ss:$8 sps:$4 sm:$0xff] (!%p276_p2)   ;;  %v786_v9 = vld [vmem:[%s1051_s6 + $0x44] ss:$8 sps:$4 sm:$0xff] (!%p276_p2)   ;;  %v788_v10 = vld [vmem:[%s1051_s6 + $0x40] ss:$8 sps:$4 sm:$0xff] (!%p276_p2)  }
   0x9   : > { %473 = vmatprep.subr.bf16.mxu0 (!%p276_p2), %v777_v3  ;;  %750 = vmatprep.subr.bf16.mxu1 (!%p276_p2), %v777_v3  ;;  %v789_v11 = vld [vmem:[%s1051_s6 + $0x54] ss:$8 sps:$4 sm:$0xff] (!%p276_p2)   ;;  %v791_v12 = vld [vmem:[%s1051_s6 + $0x50] ss:$8 sps:$4 sm:$0xff] (!%p276_p2)   ;;  %v792_v13 = vld [vmem:[%s1051_s6 + $0x64] ss:$8 sps:$4 sm:$0xff] (!%p276_p2)  }
   0xa   : > { %v794_v14 = vld [vmem:[%s1051_s6 + $0x60] ss:$8 sps:$4 sm:$0xff] (!%p276_p2)   ;;  %v795_v15 = vld [vmem:[%s1051_s6 + $0x74] ss:$8 sps:$4 sm:$0xff] (!%p276_p2)   ;;  %v797_v16 = vld [vmem:[%s1051_s6 + $0x70] ss:$8 sps:$4 sm:$0xff] (!%p276_p2)  }
   0xb   : > { %v337_v29 = vld [vmem:[%s1047_s2] sm:$0x3] (!%p276_p2)  ;;  %v382_v41 = vshrl.u32 (!%p276_p2), %v381_v37, 7 }
   0xc   : > { %474 = vmatpush1.bf16.msra.mxu0 (!%p276_p2), %v779_v4  ;;  %758 = vmatpush1.bf16.msra.mxu1 (!%p276_p2), %v779_v4  ;;  %v338_v30 = vmul.f32 (!%p276_p2), 0.005, %v337_v29  ;;  %v339_v31 = vld [vmem:[%s1048_s3] sm:$0x3] (!%p276_p2) }
   0xd   : > { %475 = vmatprep.subr.bf16.mxu0 %v780_v5  ;;  %751 = vmatprep.subr.bf16.mxu1 %v780_v5  ;;  %s1055_s21 = smov (!%p317_p3, %s721_s21), 31  ;;  %v340_v32 = vmul.f32 0.005, %v339_v31  ;;  %v344_v39 = vld [vmem:[%s1049_s4] sm:$0x3]  ;;  %v383_v43 = vsub.s32 0, %v382_v41 }
   0xe   : > { %s722_s13 = sshll.u32 %s1055_s21, 3  ;;  %v341_v33 = vmul.f32 %v338_v30, %v338_v30  ;;  %s747_s9 = sshll.u32 %s1055_s21, 4  ;;  %v348_v44 = vld [vmem:[%s1050_s5] sm:$0x3]  ;;  %v387_v45 = vsub.s32 1, %v382_v41 }
   0xf   : > { %s320_s18 = scalar_lea.vmem %s1045_s0, %s722_s13  ;;  %s938_s14 = scalar_lea.vmem %s1046_s1, %s747_s9  ;;  %v379_v57 = vld [vmem:[%s1052_s7] sm:$0x3] }
  0x10   : > { %476 = vmatpush1.bf16.msra.mxu0 %v782_v6  ;;  %759 = vmatpush1.bf16.msra.mxu1 %v782_v6  ;;  %v351_v17 = vld [vmem:[%s320_s18] sm:$0xff]  ;;  %v352_v18 = vld [vmem:[%s320_s18 + $0x8] sm:$0xff]  ;;  %v353_v23 = vld [vmem:[%s320_s18 + $0x10] sm:$0xff]  ;;  %v342_v34 = vsub.f32 %v340_v32, %v341_v33  ;;  %v967_v4 = vrot.slane %v379_v57, %v383_v43  ;;  %v969_v5 = vrot.slane %v379_v57, %v387_v45  ;;  %s992_s19 = scalar_lea.vmem %s1053_s8, %s747_s9 }
  0x11   : > { %477 = vmatprep.subr.bf16.mxu0 %v783_v7  ;;  %752 = vmatprep.subr.bf16.mxu1 %v783_v7  ;;  %v355_v19 = vld [vmem:[%s320_s18 + $0x20] sm:$0xff]  ;;  %v356_v20 = vld [vmem:[%s320_s18 + $0x28] sm:$0xff]  ;;  %v359_v21 = vpack.c.bf16 %v352_v18, %v351_v17  ;;  %v354_v24 = vld [vmem:[%s320_s18 + $0x18] sm:$0xff] }
  0x12   : > { %v361_v22 = vpack.c.bf16 %v356_v20, %v355_v19  ;;  %v357_v25 = vld [vmem:[%s320_s18 + $0x30] sm:$0xff]  ;;  %v358_v26 = vld [vmem:[%s320_s18 + $0x38] sm:$0xff]  ;;  %v360_v27 = vpack.c.bf16 %v354_v24, %v353_v23  ;;  %v343_v35 = vmax.f32 %v342_v34, 0.0  ;;  %v544_v48 = vld [vmem:[%s938_s14] sm:$0xff] }
  0x13   : > { %v362_v28 = vpack.c.bf16 %v358_v26, %v357_v25  ;;  %v552_v49 = vld [vmem:[%s938_s14 + $0x40] sm:$0xff]  ;;  %v545_v51 = vld [vmem:[%s938_s14 + $0x8] sm:$0xff]  ;;  %v546_v53 = vld [vmem:[%s938_s14 + $0x10] sm:$0xff] }
  0x14   : > { %478 = vmatpush1.bf16.msra.mxu0 %v785_v8  ;;  %760 = vmatpush1.bf16.msra.mxu1 %v785_v8  ;;  %v345_v36 = vadd.f32 1e-05, %v343_v35  ;;  %v553_v52 = vld [vmem:[%s938_s14 + $0x48] sm:$0xff]  ;;  %v554_v54 = vld [vmem:[%s938_s14 + $0x50] sm:$0xff]  ;;  %v547_v55 = vld [vmem:[%s938_s14 + $0x18] sm:$0xff] }
  0x15   : > { %479 = vmatprep.subr.bf16.mxu0 %v786_v9  ;;  %753 = vmatprep.subr.bf16.mxu1 %v786_v9  ;;  %v555_v56 = vld [vmem:[%s938_s14 + $0x58] sm:$0xff]  ;;  %v548_v6 = vld [vmem:[%s938_s14 + $0x20] sm:$0xff]  ;;  %v550_v32 = vld [vmem:[%s938_s14 + $0x30] sm:$0xff] }
  0x16   : > { %798 = vrsqrt.f32 %v345_v36  ;;  %v556_v7 = vld [vmem:[%s938_s14 + $0x60] sm:$0xff]  ;;  %v558_v33 = vld [vmem:[%s938_s14 + $0x70] sm:$0xff]  ;;  %v559_v41 = vld [vmem:[%s938_s14 + $0x78] sm:$0xff] }
  0x18   : > { %480 = vmatpush1.bf16.msra.mxu0 %v788_v10  ;;  %761 = vmatpush1.bf16.msra.mxu1 %v788_v10 }
  0x19   : > { %481 = vmatprep.subr.bf16.mxu0 %v789_v11  ;;  %754 = vmatprep.subr.bf16.mxu1 %v789_v11 }
  0x1c   : > { %482 = vmatpush1.bf16.msra.mxu0 %v791_v12  ;;  %762 = vmatpush1.bf16.msra.mxu1 %v791_v12  ;;  %v549_v12 = vld [vmem:[%s938_s14 + $0x28] sm:$0xff] }
  0x1d   : > { %483 = vmatprep.subr.bf16.mxu0 %v792_v13  ;;  %755 = vmatprep.subr.bf16.mxu1 %v792_v13  ;;  %v557_v13 = vld [vmem:[%s938_s14 + $0x68] sm:$0xff] }
  0x20   : > { %484 = vmatpush1.bf16.msra.mxu0 %v794_v14  ;;  %763 = vmatpush1.bf16.msra.mxu1 %v794_v14  ;;  %v799_v38 = vpop.eup %798 }
  0x21   : > { %485 = vmatprep.subr.bf16.mxu0 %v795_v15  ;;  %756 = vmatprep.subr.bf16.mxu1 %v795_v15  ;;  %v347_v40 = vmul.f32 %v799_v38, %v344_v39 }
  0x23   : > { %v349_v42 = vmul.f32 %v347_v40, %v338_v30  ;;  %v940_v47 = vrot.slane %v347_v40, %v383_v43  ;;  %v944_v50 = vrot.slane %v347_v40, %v387_v45  ;;  %v551_v40 = vld [vmem:[%s938_s14 + $0x38] sm:$0xff] }
  0x24   : > { %486 = vmatpush1.bf16.msra.mxu0 %v797_v16  ;;  %764 = vmatpush1.bf16.msra.mxu1 %v797_v16 }
  0x25   : > { %v350_v46 = vsub.f32 %v348_v44, %v349_v42  ;;  %v571_v58 = vmul.f32 %v940_v47, %v544_v48  ;;  %v579_v60 = vmul.f32 %v940_v47, %v552_v49  ;;  %v572_v61 = vmul.f32 %v944_v50, %v545_v51 }
  0x26   : > { %v580_v63 = vmul.f32 %v944_v50, %v553_v52  ;;  %v573_v0 = vmul.f32 %v940_v47, %v546_v53  ;;  %v581_v1 = vmul.f32 %v940_v47, %v554_v54  ;;  %v582_v3 = vmul.f32 %v944_v50, %v555_v56 }
  0x27   : > { %504 = vmatmul.mubr.bf16.vlgmr.msra.gmra.mrb[0].mxu0 %v359_v21  ;;  %524 = vmatmul.mubr.bf16.vlgmr.msra.gmra.mrb[0].mxu1 %v361_v22  ;;  %v956_v59 = vrot.slane %v350_v46, %v383_v43  ;;  %v960_v62 = vrot.slane %v350_v46, %v387_v45  ;;  %v575_v24 = vmul.f32 %v940_v47, %v548_v6 }
  0x28   : > { %513 = vmatprep.mubr.bf16.mxu0 %v808_v2  ;;  %533 = vmatprep.mubr.bf16.mxu1 %v808_v2  ;;  %v574_v2 = vmul.f32 %v944_v50, %v547_v55  ;;  %v583_v25 = vmul.f32 %v940_v47, %v556_v7  ;;  %v576_v30 = vmul.f32 %v944_v50, %v549_v12 }
  0x29   : > { %v598_v8 = vadd.f32 %v956_v59, %v571_v58  ;;  %v606_v9 = vadd.f32 %v956_v59, %v579_v60  ;;  %v599_v10 = vadd.f32 %v960_v62, %v572_v61  ;;  %v607_v11 = vadd.f32 %v960_v62, %v580_v63 }
  0x2a   : > { %v600_v16 = vadd.f32 %v956_v59, %v573_v0  ;;  %v608_v17 = vadd.f32 %v956_v59, %v581_v1  ;;  %v601_v18 = vadd.f32 %v960_v62, %v574_v2  ;;  %v609_v19 = vadd.f32 %v960_v62, %v582_v3 }
  0x2b   : > { %v584_v31 = vmul.f32 %v944_v50, %v557_v13  ;;  %v577_v49 = vmul.f32 %v940_v47, %v550_v32  ;;  %v585_v51 = vmul.f32 %v940_v47, %v558_v33  ;;  %v578_v54 = vmul.f32 %v944_v50, %v551_v40 }
  0x2c   : > { %v586_v55 = vmul.f32 %v944_v50, %v559_v41  ;;  %v602_v56 = vadd.f32 %v956_v59, %v575_v24  ;;  %v610_v57 = vadd.f32 %v956_v59, %v583_v25  ;;  %v603_v47 = vadd.f32 %v960_v62, %v576_v30 }
  0x2d   : > { %v611_v61 = vadd.f32 %v960_v62, %v584_v31  ;;  %v604_v2 = vadd.f32 %v956_v59, %v577_v49  ;;  %v612_v3 = vadd.f32 %v956_v59, %v585_v51 }
  0x2f   : > { %514 = vmatmul.mubr.bf16.gmra.mrb[4].mxu0 %v360_v27  ;;  %534 = vmatmul.mubr.bf16.gmra.mrb[4].mxu1 %v362_v28 }
  0xfa   : > { %v505_v14 = vpop.f32.mrb[0].mxu0  ;;  %v525_v15 = vpop.f32.mrb[0].mxu1 }
  0xfb   : > { %v506_v20 = vadd.f32 %v505_v14, %v967_v4  ;;  %v526_v21 = vadd.f32 %v525_v15, %v967_v4  ;;  %v507_v22 = vpop.f32.mrb[1].mxu0  ;;  %v527_v23 = vpop.f32.mrb[1].mxu1 }
  0xfc   : > { %v508_v26 = vadd.f32 %v507_v22, %v969_v5  ;;  %v528_v27 = vadd.f32 %v527_v23, %v969_v5  ;;  %v509_v28 = vpop.f32.mrb[2].mxu0  ;;  %v529_v29 = vpop.f32.mrb[2].mxu1 }
  0xfd   : > { %v614_v34 = vadd.f32 %v598_v8, %v506_v20  ;;  %v622_v35 = vadd.f32 %v606_v9, %v526_v21  ;;  %v510_v36 = vadd.f32 %v509_v28, %v967_v4  ;;  %v530_v37 = vadd.f32 %v529_v29, %v967_v4  ;;  %v511_v38 = vpop.f32.mrb[3].mxu0  ;;  %v531_v39 = vpop.f32.mrb[3].mxu1 }
  0xfe   : > { %v615_v42 = vadd.f32 %v599_v10, %v508_v26  ;;  %v623_v43 = vadd.f32 %v607_v11, %v528_v27  ;;  %v512_v44 = vadd.f32 %v511_v38, %v969_v5  ;;  %v532_v45 = vadd.f32 %v531_v39, %v969_v5 }
  0xff   : > { %630 = vst [vmem:[%s992_s19] sm:$0xff] %v614_v34  ;;  %638 = vst [vmem:[%s992_s19 + $0x40] sm:$0xff] %v622_v35  ;;  %v616_v46 = vadd.f32 %v600_v16, %v510_v36  ;;  %v624_v48 = vadd.f32 %v608_v17, %v530_v37  ;;  %v605_v10 = vadd.f32 %v960_v62, %v578_v54 }
 0x100   : > { %631 = vst [vmem:[%s992_s19 + $0x8] sm:$0xff] %v615_v42  ;;  %639 = vst [vmem:[%s992_s19 + $0x48] sm:$0xff] %v623_v43  ;;  %v617_v52 = vadd.f32 %v601_v18, %v512_v44  ;;  %v625_v53 = vadd.f32 %v609_v19, %v532_v45  ;;  %v613_v11 = vadd.f32 %v960_v62, %v586_v55 }
 0x101   : > { %632 = vst [vmem:[%s992_s19 + $0x10] sm:$0xff] %v616_v46  ;;  %640 = vst [vmem:[%s992_s19 + $0x50] sm:$0xff] %v624_v48 }
 0x102   : > { %633 = vst [vmem:[%s992_s19 + $0x18] sm:$0xff] %v617_v52  ;;  %641 = vst [vmem:[%s992_s19 + $0x58] sm:$0xff] %v625_v53  ;;  %v515_v58 = vpop.f32.mrb[4].mxu0  ;;  %v535_v60 = vpop.f32.mrb[4].mxu1 }
 0x103   : > { %v516_v63 = vadd.f32 %v515_v58, %v967_v4  ;;  %v536_v0 = vadd.f32 %v535_v60, %v967_v4  ;;  %v517_v1 = vpop.f32.mrb[5].mxu0  ;;  %v537_v50 = vpop.f32.mrb[5].mxu1 }
 0x104   : > { %v518_v6 = vadd.f32 %v517_v1, %v969_v5  ;;  %v538_v7 = vadd.f32 %v537_v50, %v969_v5  ;;  %v519_v8 = vpop.f32.mrb[6].mxu0  ;;  %v539_v9 = vpop.f32.mrb[6].mxu1 }
 0x105   : > { %v618_v12 = vadd.f32 %v602_v56, %v516_v63  ;;  %v626_v13 = vadd.f32 %v610_v57, %v536_v0  ;;  %v520_v14 = vadd.f32 %v519_v8, %v967_v4  ;;  %v540_v59 = vadd.f32 %v539_v9, %v967_v4  ;;  %v521_v15 = vpop.f32.mrb[7].mxu0  ;;  %v541_v16 = vpop.f32.mrb[7].mxu1 }
 0x106   : > { %v619_v17 = vadd.f32 %v603_v47, %v518_v6  ;;  %v627_v18 = vadd.f32 %v611_v61, %v538_v7  ;;  %v522_v19 = vadd.f32 %v521_v15, %v969_v5  ;;  %v542_v20 = vadd.f32 %v541_v16, %v969_v5 }
 0x107   : > { %634 = vst [vmem:[%s992_s19 + $0x20] sm:$0xff] %v618_v12  ;;  %642 = vst [vmem:[%s992_s19 + $0x60] sm:$0xff] %v626_v13  ;;  %v620_v62 = vadd.f32 %v604_v2, %v520_v14  ;;  %v628_v21 = vadd.f32 %v612_v3, %v540_v59 }
 0x108   : > { %635 = vst [vmem:[%s992_s19 + $0x28] sm:$0xff] %v619_v17  ;;  %643 = vst [vmem:[%s992_s19 + $0x68] sm:$0xff] %v627_v18  ;;  %v621_v22 = vadd.f32 %v605_v10, %v522_v19  ;;  %v629_v23 = vadd.f32 %v613_v11, %v542_v20 }
 0x109   : > { %636 = vst [vmem:[%s992_s19 + $0x30] sm:$0xff] %v620_v62  ;;  %644 = vst [vmem:[%s992_s19 + $0x70] sm:$0xff] %v628_v21 }
 0x10a   : > { %637 = vst [vmem:[%s992_s19 + $0x38] sm:$0xff] %v621_v22  ;;  %645 = vst [vmem:[%s992_s19 + $0x78] sm:$0xff] %v629_v23 }
 0x10b PF: > { %s18_s27 = sadd.s32 1, %s806_s27  }
 0x10c   : > { %p15_p4 = scmp.ge.s32.totalorder %s18_s27, 6  }
 0x10e   :  { %17 = sbr.rel (!%p15_p4) target bundleno = 1 (0x1), region = 85 }

// kernel: residual_block.3
= control target key start
LH: loop header
LB: loop body
LE: loop exit
PB: predicated region body
PF: predicated region fallthrough
CT: control target
= control target key end

     0   :  { %s827_s18 = smov 0   ;;  %s1030_s0 = inlined_call_operand.vmem [shape: f32[256,128], index: 0, kind: input, shape index: {}]   ;;  %s1031_s1 = inlined_call_operand.vmem [shape: bf16[128,256], index: 1, kind: input, shape index: {}]   ;;  %s1032_s2 = inlined_call_operand.vmem [shape: f32[1,256], index: 2, kind: input, shape index: {}]   ;;  %s1033_s3 = inlined_call_operand.vmem [shape: f32[256,256], index: 3, kind: output, shape index: {0}]   ;;  %s1034_s4 = inlined_call_operand.vmem [shape: f32[1,256], index: 4, kind: output, shape index: {1}]   ;;  %s1035_s5 = inlined_call_operand.vmem [shape: f32[1,256], index: 5, kind: output, shape index: {2}]  }
   0x1 LB: > { %s833_s19 = sadd.s32 4294967295, %s792_s18   ;;  %p708_p0 = scmp.ge.s32.totalorder %s792_s18, 1  ;;  %s792_s18 = sphi %s827_s18, %s16_s18  }
   0x2   : > { %p183_p1 = scmp.lt.s32.totalorder %s792_s18, 5 }
   0x4   : > { %p184_p2 = pnand %p708_p0, %p183_p1 }
   0x5   : > { %s709_s20 = sshll.u32 (!%p184_p2), %s833_s19, 3  ;;  %p714_p4 = scmp.ne.s32.totalorder (!%p184_p2), %s833_s19, 0 }
   0x6   : > { %187 = sbr.rel (%p184_p2) target bundleno = 315 (0x13b), region = 32  ;;  %p213_p3 = scmp.lt.s32.totalorder (!%p184_p2), %s709_s20, 31 }
   0xd   : > { %s1037_s20 = smov (!%p213_p3, %s709_s20), 31  ;;  %229 = sbr.rel (%p714_p4) target bundleno = 20 (0x14), region = 36 }
   0xe   : > { %s710_s21 = sshll.u32 %s1037_s20, 3  ;;  %s734_s22 = sshll.u32 %s1037_s20, 4  ;;  %v230_v0 = vlaneseq (!%p714_p4)  ;;  %v794_v1 = vmov (!%p714_p4), 0.0  }
   0xf   : > { %s841_s25 = scalar_lea.vmem %s1030_s0, %s710_s21  ;;  %s846_s28 = scalar_lea.vmem %s1033_s3, %s734_s22 }
  0x10   : > { %vm232_vm0 = vcmp.lt.s32.totalorder (!%p714_p4), %v230_v0, 256 }
  0x11   : > { %234 = vst.msk [vmem:[%s1034_s4] sm:$0x3] (!%p714_p4), %vm232_vm0, %v794_v1  ;;  %235 = vst.msk [vmem:[%s1035_s5] sm:$0x3] (!%p714_p4), %vm232_vm0, %v794_v1 }
  0x14 PF: > { %v762_v2 = vld [vmem:[%s1031_s1 + $0x4] ss:$8 sps:$4 sm:$0xff]   ;;  %v764_v3 = vld [vmem:[%s1031_s1] ss:$8 sps:$4 sm:$0xff]   ;;  %v795_v4 = vmov 0   ;;  %v238_v25 = vld [vmem:[%s841_s25 + $0x10] sm:$0xff]  ;;  %v266_v31 = vlaneseq }
  0x15   : > { %388 = vmatprep.mubr.bf16.mxu0 %v795_v4  ;;  %408 = vmatprep.mubr.bf16.mxu1 %v795_v4  ;;  %v765_v5 = vld [vmem:[%s1031_s1 + $0x14] ss:$8 sps:$4 sm:$0xff]   ;;  %v767_v6 = vld [vmem:[%s1031_s1 + $0x10] ss:$8 sps:$4 sm:$0xff]   ;;  %v768_v7 = vld [vmem:[%s1031_s1 + $0x24] ss:$8 sps:$4 sm:$0xff]  }
  0x16   : > { %356 = vmatprep.subr.bf16.mxu0 %v762_v2  ;;  %735 = vmatprep.subr.bf16.mxu1 %v762_v2  ;;  %v770_v8 = vld [vmem:[%s1031_s1 + $0x20] ss:$8 sps:$4 sm:$0xff]   ;;  %v771_v9 = vld [vmem:[%s1031_s1 + $0x34] ss:$8 sps:$4 sm:$0xff]   ;;  %v773_v10 = vld [vmem:[%s1031_s1 + $0x30] ss:$8 sps:$4 sm:$0xff]  }
  0x17   : > { %357 = vmatpush1.bf16.msra.mxu0 %v764_v3  ;;  %743 = vmatpush1.bf16.msra.mxu1 %v764_v3  ;;  %v774_v11 = vld [vmem:[%s1031_s1 + $0x44] ss:$8 sps:$4 sm:$0xff]   ;;  %v776_v12 = vld [vmem:[%s1031_s1 + $0x40] ss:$8 sps:$4 sm:$0xff]   ;;  %v777_v13 = vld [vmem:[%s1031_s1 + $0x54] ss:$8 sps:$4 sm:$0xff]  }
  0x18   : > { %358 = vmatprep.subr.bf16.mxu0 %v765_v5  ;;  %736 = vmatprep.subr.bf16.mxu1 %v765_v5  ;;  %v779_v14 = vld [vmem:[%s1031_s1 + $0x50] ss:$8 sps:$4 sm:$0xff]   ;;  %v780_v15 = vld [vmem:[%s1031_s1 + $0x64] ss:$8 sps:$4 sm:$0xff]   ;;  %v782_v16 = vld [vmem:[%s1031_s1 + $0x60] ss:$8 sps:$4 sm:$0xff]  }
  0x19   : > { %v783_v17 = vld [vmem:[%s1031_s1 + $0x74] ss:$8 sps:$4 sm:$0xff]   ;;  %v785_v18 = vld [vmem:[%s1031_s1 + $0x70] ss:$8 sps:$4 sm:$0xff]   ;;  %v236_v19 = vld [vmem:[%s841_s25] sm:$0xff]  ;;  %v912_v32 = vshrl.u32 %v266_v31, 7 }
  0x1a   : > { %v237_v20 = vld [vmem:[%s841_s25 + $0x8] sm:$0xff]  ;;  %v240_v21 = vld [vmem:[%s841_s25 + $0x20] sm:$0xff]  ;;  %v239_v26 = vld [vmem:[%s841_s25 + $0x18] sm:$0xff]  ;;  %s731_s21 = sshll.u32 %s833_s19, 6  ;;  %vm568_vm9 = vcmp.lt.s32.totalorder %v266_v31, 256 }
  0x1b   : > { %359 = vmatpush1.bf16.msra.mxu0 %v767_v6  ;;  %744 = vmatpush1.bf16.msra.mxu1 %v767_v6  ;;  %v241_v22 = vld [vmem:[%s841_s25 + $0x28] sm:$0xff]  ;;  %v244_v23 = vpack.c.bf16 %v237_v20, %v236_v19  ;;  %v242_v27 = vld [vmem:[%s841_s25 + $0x30] sm:$0xff]  ;;  %v243_v28 = vld [vmem:[%s841_s25 + $0x38] sm:$0xff]  ;;  %v245_v29 = vpack.c.bf16 %v239_v26, %v238_v25  ;;  %v463_v33 = vadd.s32 8, %v912_v32  ;;  %v268_v34 = vsub.s32 0, %v912_v32 }
  0x1c   : > { %360 = vmatprep.subr.bf16.mxu0 %v768_v7  ;;  %737 = vmatprep.subr.bf16.mxu1 %v768_v7  ;;  %v246_v24 = vpack.c.bf16 %v241_v22, %v240_v21  ;;  %v247_v30 = vpack.c.bf16 %v243_v28, %v242_v27  ;;  %v471_v35 = vstv %s731_s21  ;;  %v466_v36 = vadd.s32 32, %v912_v32  ;;  %v264_v38 = vld [vmem:[%s1032_s2] sm:$0x3] }
  0x1d   : > { %v467_v37 = vadd.s32 40, %v912_v32  ;;  %v272_v39 = vsub.s32 1, %v912_v32  ;;  %v464_v40 = vadd.s32 16, %v912_v32  ;;  %v472_v41 = vadd.s32 %v471_v35, %v912_v32 }
  0x1e   : > { %v473_v42 = vadd.s32 %v471_v35, %v463_v33  ;;  %v465_v43 = vadd.s32 24, %v912_v32  ;;  %v926_v44 = vrot.slane %v264_v38, %v268_v34  ;;  %v476_v45 = vadd.s32 %v471_v35, %v466_v36 }
  0x1f   : > { %361 = vmatpush1.bf16.msra.mxu0 %v770_v8  ;;  %745 = vmatpush1.bf16.msra.mxu1 %v770_v8  ;;  %v928_v46 = vadd.s32 %v471_v35, %v467_v37  ;;  %v930_v47 = vrot.slane %v264_v38, %v272_v39  ;;  %v932_v48 = vadd.s32 %v471_v35, %v464_v40  ;;  %v468_v49 = vadd.s32 48, %v912_v32 }
  0x20   : > { %362 = vmatprep.subr.bf16.mxu0 %v771_v9  ;;  %738 = vmatprep.subr.bf16.mxu1 %v771_v9  ;;  %vm480_vm1 = vcmp.lt.s32.totalorder %v472_v41, 200  ;;  %vm481_vm2 = vcmp.lt.s32.totalorder %v473_v42, 200  ;;  %v935_v52 = vadd.s32 %v471_v35, %v465_v43  ;;  %v469_v53 = vadd.s32 56, %v912_v32 }
  0x21   : > { %vm484_vm3 = vcmp.lt.s32.totalorder %v476_v45, 200  ;;  %vm485_vm4 = vcmp.lt.s32.totalorder %v928_v46, 200  ;;  %vm482_vm5 = vcmp.lt.s32.totalorder %v932_v48, 200  ;;  %v944_v62 = vadd.s32 %v471_v35, %v468_v49 }
  0x22   : > { %vm483_vm6 = vcmp.lt.s32.totalorder %v935_v52, 200  ;;  %v950_v8 = vadd.s32 %v471_v35, %v469_v53 }
  0x23   : > { %363 = vmatpush1.bf16.msra.mxu0 %v773_v10  ;;  %746 = vmatpush1.bf16.msra.mxu1 %v773_v10  ;;  %vm486_vm7 = vcmp.lt.s32.totalorder %v944_v62, 200 }
  0x24   : > { %364 = vmatprep.subr.bf16.mxu0 %v774_v11  ;;  %739 = vmatprep.subr.bf16.mxu1 %v774_v11  ;;  %vm487_vm8 = vcmp.lt.s32.totalorder %v950_v8, 200 }
  0x27   : > { %365 = vmatpush1.bf16.msra.mxu0 %v776_v12  ;;  %747 = vmatpush1.bf16.msra.mxu1 %v776_v12 }
  0x28   : > { %366 = vmatprep.subr.bf16.mxu0 %v777_v13  ;;  %740 = vmatprep.subr.bf16.mxu1 %v777_v13 }
  0x2b   : > { %367 = vmatpush1.bf16.msra.mxu0 %v779_v14  ;;  %748 = vmatpush1.bf16.msra.mxu1 %v779_v14 }
  0x2c   : > { %368 = vmatprep.subr.bf16.mxu0 %v780_v15  ;;  %741 = vmatprep.subr.bf16.mxu1 %v780_v15 }
  0x2f   : > { %369 = vmatpush1.bf16.msra.mxu0 %v782_v16  ;;  %749 = vmatpush1.bf16.msra.mxu1 %v782_v16 }
  0x30   : > { %370 = vmatprep.subr.bf16.mxu0 %v783_v17  ;;  %742 = vmatprep.subr.bf16.mxu1 %v783_v17 }
  0x33   : > { %371 = vmatpush1.bf16.msra.mxu0 %v785_v18  ;;  %750 = vmatpush1.bf16.msra.mxu1 %v785_v18 }
  0x36   : > { %389 = vmatmul.mubr.bf16.vlgmr.msra.gmra.mrb[0].mxu0 %v244_v23  ;;  %409 = vmatmul.mubr.bf16.vlgmr.msra.gmra.mrb[0].mxu1 %v246_v24 }
  0x37   : > { %398 = vmatprep.mubr.bf16.mxu0 %v795_v4  ;;  %418 = vmatprep.mubr.bf16.mxu1 %v795_v4 }
  0x3e   : > { %399 = vmatmul.mubr.bf16.gmra.mrb[4].mxu0 %v245_v29  ;;  %419 = vmatmul.mubr.bf16.gmra.mrb[4].mxu1 %v247_v30 }
 0x109   : > { %v390_v50 = vpop.f32.mrb[0].mxu0  ;;  %v410_v51 = vpop.f32.mrb[0].mxu1 }
 0x10a   : > { %v391_v54 = vadd.f32 %v390_v50, %v926_v44  ;;  %v392_v55 = vpop.f32.mrb[1].mxu0  ;;  %v411_v56 = vadd.f32 %v410_v51, %v926_v44  ;;  %v412_v57 = vpop.f32.mrb[1].mxu1 }
 0x10b   : > { %v393_v58 = vadd.f32 %v392_v55, %v930_v47  ;;  %v394_v59 = vpop.f32.mrb[2].mxu0  ;;  %v413_v60 = vadd.f32 %v412_v57, %v930_v47  ;;  %v414_v61 = vpop.f32.mrb[2].mxu1 }
 0x10c   : > { %v429_v63 = vmax.f32 %v391_v54, 0.0  ;;  %v395_v0 = vadd.f32 %v394_v59, %v926_v44  ;;  %v396_v1 = vpop.f32.mrb[3].mxu0  ;;  %v437_v2 = vmax.f32 %v411_v56, 0.0  ;;  %v415_v3 = vadd.f32 %v414_v61, %v926_v44  ;;  %v416_v4 = vpop.f32.mrb[3].mxu1 }
 0x10d   : > { %v430_v5 = vmax.f32 %v393_v58, 0.0  ;;  %v397_v6 = vadd.f32 %v396_v1, %v930_v47  ;;  %v438_v7 = vmax.f32 %v413_v60, 0.0  ;;  %v417_v15 = vadd.f32 %v416_v4, %v930_v47 }
 0x10e   : > { %445 = vst [vmem:[%s846_s28] sm:$0xff] %v429_v63  ;;  %v504_v9 = vsel %vm480_vm1, %v429_v63, 0.0  ;;  %v431_v10 = vmax.f32 %v395_v0, 0.0  ;;  %453 = vst [vmem:[%s846_s28 + $0x40] sm:$0xff] %v437_v2  ;;  %v956_v11 = vsel %vm484_vm3, %v437_v2, 0.0  ;;  %v439_v12 = vmax.f32 %v415_v3, 0.0 }
 0x10f   : > { %446 = vst [vmem:[%s846_s28 + $0x8] sm:$0xff] %v430_v5  ;;  %v505_v13 = vsel %vm480_vm1, %v430_v5, 0.0  ;;  %v432_v14 = vmax.f32 %v397_v6, 0.0  ;;  %454 = vst [vmem:[%s846_s28 + $0x48] sm:$0xff] %v438_v7  ;;  %v572_v16 = vmul.f32 %v504_v9, %v504_v9  ;;  %v967_v19 = vmul.f32 %v956_v11, %v956_v11 }
 0x110   : > { %v573_v17 = vmul.f32 %v505_v13, %v505_v13  ;;  %447 = vst [vmem:[%s846_s28 + $0x10] sm:$0xff] %v431_v10  ;;  %v506_v18 = vsel %vm481_vm2, %v431_v10, 0.0  ;;  %455 = vst [vmem:[%s846_s28 + $0x50] sm:$0xff] %v439_v12  ;;  %v513_v23 = vsel %vm484_vm3, %v438_v7, 0.0  ;;  %v514_v28 = vsel %vm485_vm4, %v439_v12, 0.0 }
 0x111   : > { %v521_v20 = vadd.f32 %v506_v18, %v504_v9  ;;  %v574_v21 = vmul.f32 %v506_v18, %v506_v18  ;;  %448 = vst [vmem:[%s846_s28 + $0x18] sm:$0xff] %v432_v14  ;;  %v507_v22 = vsel %vm481_vm2, %v432_v14, 0.0  ;;  %v400_v24 = vpop.f32.mrb[4].mxu0  ;;  %v420_v25 = vpop.f32.mrb[4].mxu1  ;;  %v440_v35 = vmax.f32 %v417_v15, 0.0 }
 0x112   : > { %v534_v26 = vadd.f32 %v507_v22, %v505_v13  ;;  %v575_v27 = vmul.f32 %v507_v22, %v507_v22  ;;  %v401_v29 = vadd.f32 %v400_v24, %v926_v44  ;;  %v402_v30 = vpop.f32.mrb[5].mxu0  ;;  %v422_v33 = vpop.f32.mrb[5].mxu1  ;;  %v421_v38 = vadd.f32 %v420_v25, %v926_v44 }
 0x113   : > { %v588_v34 = vadd.f32 %v574_v21, %v572_v16  ;;  %v403_v36 = vadd.f32 %v402_v30, %v930_v47  ;;  %v404_v37 = vpop.f32.mrb[6].mxu0  ;;  %v424_v39 = vpop.f32.mrb[6].mxu1  ;;  %v423_v45 = vadd.f32 %v422_v33, %v930_v47  ;;  %v581_v50 = vmul.f32 %v513_v23, %v513_v23  ;;  %456 = vst [vmem:[%s846_s28 + $0x58] sm:$0xff] %v440_v35 }
 0x114   : > { %v601_v40 = vadd.f32 %v575_v27, %v573_v17  ;;  %v433_v41 = vmax.f32 %v401_v29, 0.0  ;;  %v405_v42 = vadd.f32 %v404_v37, %v926_v44  ;;  %v406_v43 = vpop.f32.mrb[7].mxu0  ;;  %v426_v49 = vpop.f32.mrb[7].mxu1  ;;  %v441_v54 = vmax.f32 %v421_v38, 0.0 }
 0x115   : > { %v434_v51 = vmax.f32 %v403_v36, 0.0  ;;  %v407_v53 = vadd.f32 %v406_v43, %v930_v47  ;;  %v582_v55 = vmul.f32 %v514_v28, %v514_v28  ;;  %v442_v58 = vmax.f32 %v423_v45, 0.0 }
 0x116   : > { %449 = vst [vmem:[%s846_s28 + $0x20] sm:$0xff] %v433_v41  ;;  %v508_v56 = vsel %vm482_vm5, %v433_v41, 0.0  ;;  %v435_v57 = vmax.f32 %v405_v42, 0.0  ;;  %457 = vst [vmem:[%s846_s28 + $0x60] sm:$0xff] %v441_v54  ;;  %v515_v0 = vsel %vm485_vm4, %v440_v35, 0.0  ;;  %v516_v46 = vsel %vm486_vm7, %v441_v54, 0.0 }
 0x117   : > { %v522_v59 = vadd.f32 %v521_v20, %v508_v56  ;;  %v576_v60 = vmul.f32 %v508_v56, %v508_v56  ;;  %450 = vst [vmem:[%s846_s28 + $0x28] sm:$0xff] %v434_v51  ;;  %v509_v61 = vsel %vm482_vm5, %v434_v51, 0.0  ;;  %v436_v63 = vmax.f32 %v407_v53, 0.0  ;;  %458 = vst [vmem:[%s846_s28 + $0x68] sm:$0xff] %v442_v58 }
 0x118   : > { %v535_v1 = vadd.f32 %v534_v26, %v509_v61  ;;  %v577_v2 = vmul.f32 %v509_v61, %v509_v61  ;;  %451 = vst [vmem:[%s846_s28 + $0x30] sm:$0xff] %v435_v57  ;;  %v510_v3 = vsel %vm483_vm6, %v435_v57, 0.0  ;;  %v517_v14 = vsel %vm486_vm7, %v442_v58, 0.0 }
 0x119   : > { %v589_v4 = vadd.f32 %v588_v34, %v576_v60  ;;  %v523_v5 = vadd.f32 %v522_v59, %v510_v3  ;;  %v578_v6 = vmul.f32 %v510_v3, %v510_v3  ;;  %452 = vst [vmem:[%s846_s28 + $0x38] sm:$0xff] %v436_v63  ;;  %v511_v48 = vsel %vm483_vm6, %v436_v63, 0.0 }
 0x11a   : > { %v602_v7 = vadd.f32 %v601_v40, %v577_v2  ;;  %v536_v9 = vadd.f32 %v535_v1, %v511_v48  ;;  %v579_v10 = vmul.f32 %v511_v48, %v511_v48  ;;  %v425_v15 = vadd.f32 %v424_v39, %v926_v44 }
 0x11b   : > { %v524_v12 = vadd.f32 %v523_v5, %v956_v11  ;;  %v590_v13 = vadd.f32 %v589_v4, %v578_v6  ;;  %v583_v16 = vmul.f32 %v515_v0, %v515_v0  ;;  %v427_v52 = vadd.f32 %v426_v49, %v930_v47 }
 0x11c   : > { %v537_v17 = vadd.f32 %v536_v9, %v513_v23  ;;  %v603_v18 = vadd.f32 %v602_v7, %v579_v10  ;;  %v584_v22 = vmul.f32 %v516_v46, %v516_v46  ;;  %v443_v24 = vmax.f32 %v425_v15, 0.0 }
 0x11d   : > { %v591_v20 = vadd.f32 %v590_v13, %v967_v19  ;;  %v525_v21 = vadd.f32 %v524_v12, %v514_v28  ;;  %v585_v26 = vmul.f32 %v517_v14, %v517_v14  ;;  %v444_v27 = vmax.f32 %v427_v52, 0.0 }
 0x11e   : > { %v604_v25 = vadd.f32 %v603_v18, %v581_v50  ;;  %v538_v11 = vadd.f32 %v537_v17, %v515_v0  ;;  %459 = vst [vmem:[%s846_s28 + $0x70] sm:$0xff] %v443_v24  ;;  %v518_v44 = vsel %vm487_vm8, %v443_v24, 0.0  ;;  %v796_v45 = vmov 1966171168  }
 0x11f   : > { %v526_v62 = vadd.f32 %v525_v21, %v516_v46  ;;  %v592_v29 = vadd.f32 %v591_v20, %v582_v55  ;;  %460 = vst [vmem:[%s846_s28 + $0x78] sm:$0xff] %v444_v27  ;;  %v519_v47 = vsel %vm487_vm8, %v444_v27, 0.0  ;;  %v586_v33 = vmul.f32 %v518_v44, %v518_v44  ;;  %v520_v46 = vld [vmem:[%s1034_s4] sm:$0x3] }
 0x120   : > { %v539_v23 = vadd.f32 %v538_v11, %v517_v14  ;;  %v605_v30 = vadd.f32 %v604_v25, %v583_v16  ;;  %v587_v36 = vmul.f32 %v519_v47, %v519_v47  ;;  %v551_v49 = vunpack.c.l.s4 %v796_v45  ;;  %v571_v14 = vld [vmem:[%s1035_s5] sm:$0x3] }
 0x121   : > { %v593_v19 = vadd.f32 %v592_v29, %v584_v22  ;;  %v527_v28 = vadd.f32 %v526_v62, %v518_v44 }
 0x122   : > { %v606_v34 = vadd.f32 %v605_v30, %v585_v26  ;;  %v540_v35 = vadd.f32 %v539_v23, %v519_v47  ;;  %v552_v58 = vunpack.c.0.s8 %v551_v49 }
 0x123   : > { %v528_v37 = vrot.slane %v527_v28, 4  ;;  %v594_v38 = vadd.f32 %v593_v19, %v586_v33 }
 0x124   : > { %v541_v39 = vrot.slane %v540_v35, 4  ;;  %v607_v40 = vadd.f32 %v606_v34, %v587_v36  ;;  %v555_v4 = vsub.s32 %v552_v58, %v912_v32 }
 0x125   : > { %v529_v41 = vadd.f32 %v528_v37, %v527_v28  ;;  %v595_v42 = vrot.slane %v594_v38, 4 }
 0x126   : > { %v542_v43 = vadd.f32 %v541_v39, %v540_v35  ;;  %v608_v50 = vrot.slane %v607_v40, 4 }
 0x127   : > { %v530_v51 = vrot.slane %v529_v41, 2  ;;  %v596_v53 = vadd.f32 %v595_v42, %v594_v38 }
 0x128   : > { %v543_v8 = vrot.slane %v542_v43, 2  ;;  %v609_v54 = vadd.f32 %v608_v50, %v607_v40 }
 0x129   : > { %v531_v55 = vadd.f32 %v530_v51, %v529_v41  ;;  %v597_v56 = vrot.slane %v596_v53, 2 }
 0x12a   : > { %v544_v57 = vadd.f32 %v543_v8, %v542_v43  ;;  %v610_v59 = vrot.slane %v609_v54, 2 }
 0x12b   : > { %v532_v60 = vrot.slane %v531_v55, 1  ;;  %v598_v61 = vadd.f32 %v597_v56, %v596_v53 }
 0x12c   : > { %v545_v63 = vrot.slane %v544_v57, 1  ;;  %v611_v0 = vadd.f32 %v610_v59, %v609_v54 }
 0x12d   : > { %v533_v1 = vadd.f32 %v532_v60, %v531_v55  ;;  %v599_v2 = vrot.slane %v598_v61, 1 }
 0x12e   : > { %v546_v3 = vadd.f32 %v545_v63, %v544_v57  ;;  %v612_v5 = vrot.slane %v611_v0, 1 }
 0x12f   : > { %v600_v6 = vadd.f32 %v599_v2, %v598_v61 }
 0x130   : > { %v549_v48 = vcombine.low %v533_v1, %v546_v3  ;;  %v613_v7 = vadd.f32 %v612_v5, %v611_v0 }
 0x132   : > { %v556_v9 = vrot.slane %v549_v48, %v555_v4  ;;  %v616_v10 = vcombine.low %v600_v6, %v613_v7 }
 0x134   : > { %v563_v12 = vrot.slane %v556_v9, %v555_v4  ;;  %v623_v13 = vrot.slane %v616_v10, %v555_v4 }
 0x136   : > { %v565_v15 = vadd.f32 %v563_v12, %v520_v46  ;;  %v630_v32 = vrot.slane %v623_v13, %v555_v4 }
 0x138   : > { %570 = vst.msk [vmem:[%s1034_s4] sm:$0x3] %vm568_vm9, %v565_v15  ;;  %v632_v16 = vadd.f32 %v630_v32, %v571_v14 }
 0x13a   : > { %633 = vst.msk [vmem:[%s1035_s5] sm:$0x3] %vm568_vm9, %v632_v16 }
 0x13b PF: > { %s16_s18 = sadd.s32 1, %s792_s18  }
 0x13c   : > { %p13_p5 = scmp.ge.s32.totalorder %s16_s18, 6  }
 0x13e   :  { %15 = sbr.rel (!%p13_p5) target bundleno = 1 (0x1), region = 82 }

// kernel: residual_block.4
= control target key start
LH: loop header
LB: loop body
LE: loop exit
PB: predicated region body
PF: predicated region fallthrough
CT: control target
= control target key end

     0   :  { %s1191_s30 = smov 0   ;;  %s1472_s0 = inlined_call_operand.vmem [shape: f32[256,256], index: 0, kind: input, shape index: {}]   ;;  %s1473_s1 = inlined_call_operand.vmem [shape: f32[1,256], index: 1, kind: input, shape index: {}]   ;;  %s1474_s2 = inlined_call_operand.vmem [shape: f32[1,256], index: 2, kind: input, shape index: {}]   ;;  %s1475_s3 = inlined_call_operand.vmem [shape: f32[1,256], index: 3, kind: input, shape index: {}]   ;;  %s1476_s4 = inlined_call_operand.vmem [shape: f32[1,256], index: 4, kind: input, shape index: {}]   ;;  %s1477_s5 = inlined_call_operand.vmem [shape: bf16[256,256], index: 5, kind: input, shape index: {}]   ;;  %s1478_s6 = inlined_call_operand.vmem [shape: f32[1,256], index: 6, kind: input, shape index: {}]   ;;  %s1479_s7 = inlined_call_operand.vmem [shape: f32[256,256], index: 7, kind: output, shape index: {0}]   ;;  %s1480_s8 = inlined_call_operand.vmem [shape: f32[1,256], index: 8, kind: output, shape index: {1}]   ;;  %s1481_s9 = inlined_call_operand.vmem [shape: f32[1,256], index: 9, kind: output, shape index: {2}]  }
   0x1 LB: > { %s1197_s10 = sadd.s32 4294967295, %s1137_s30   ;;  %p994_p0 = scmp.ge.s32.totalorder %s1137_s30, 1  ;;  %s1137_s30 = sphi %s1191_s30, %s20_s30  }
   0x2   : > { %p284_p1 = scmp.lt.s32.totalorder %s1137_s30, 5 }
   0x4   : > { %p285_p2 = pnand %p994_p0, %p284_p1 }
   0x5   : > { %s995_s11 = sshll.u32 (!%p285_p2), %s1197_s10, 3  ;;  %p1001_p4 = scmp.ne.s32.totalorder (!%p285_p2), %s1197_s10, 0 }
   0x6   : > { %288 = sbr.rel (%p285_p2) target bundleno = 346 (0x15a), region = 48  ;;  %p323_p3 = scmp.lt.s32.totalorder (!%p285_p2), %s995_s11, 31 }
   0xd   : > { %s1483_s11 = smov (!%p323_p3, %s995_s11), 31  ;;  %339 = sbr.rel (%p1001_p4) target bundleno = 20 (0x14), region = 52 }
   0xe   : > { %s1037_s12 = sshll.u32 %s1483_s11, 4  ;;  %v340_v0 = vlaneseq (!%p1001_p4)  ;;  %v1139_v1 = vmov (!%p1001_p4), 0.0  }
   0xf   : > { %s1205_s15 = scalar_lea.vmem %s1472_s0, %s1037_s12  ;;  %s1210_s18 = scalar_lea.vmem %s1479_s7, %s1037_s12 }
  0x10   : > { %vm342_vm0 = vcmp.lt.s32.totalorder (!%p1001_p4), %v340_v0, 256 }
  0x11   : > { %344 = vst.msk [vmem:[%s1480_s8] sm:$0x3] (!%p1001_p4), %vm342_vm0, %v1139_v1  ;;  %345 = vst.msk [vmem:[%s1481_s9] sm:$0x3] (!%p1001_p4), %vm342_vm0, %v1139_v1 }
  0x14 PF: > { %v1081_v2 = vld [vmem:[%s1477_s5 + $0x4] ss:$8 sps:$4 sm:$0xff]   ;;  %v1083_v3 = vld [vmem:[%s1477_s5] ss:$8 sps:$4 sm:$0xff]   ;;  %v1084_v4 = vld [vmem:[%s1477_s5 + $0x14] ss:$8 sps:$4 sm:$0xff]   ;;  %v377_v29 = vlaneseq }
  0x15   : > { %642 = vmatprep.subr.bf16.mxu0 %v1081_v2  ;;  %1039 = vmatprep.subr.bf16.mxu1 %v1081_v2  ;;  %v1086_v5 = vld [vmem:[%s1477_s5 + $0x10] ss:$8 sps:$4 sm:$0xff]   ;;  %v1087_v6 = vld [vmem:[%s1477_s5 + $0x24] ss:$8 sps:$4 sm:$0xff]   ;;  %v1089_v7 = vld [vmem:[%s1477_s5 + $0x20] ss:$8 sps:$4 sm:$0xff]  }
  0x16   : > { %643 = vmatpush1.bf16.msra.mxu0 %v1083_v3  ;;  %1055 = vmatpush1.bf16.msra.mxu1 %v1083_v3  ;;  %v1090_v8 = vld [vmem:[%s1477_s5 + $0x34] ss:$8 sps:$4 sm:$0xff]   ;;  %v1092_v9 = vld [vmem:[%s1477_s5 + $0x30] ss:$8 sps:$4 sm:$0xff]   ;;  %v1093_v10 = vld [vmem:[%s1477_s5 + $0x44] ss:$8 sps:$4 sm:$0xff]  }
  0x17   : > { %644 = vmatprep.subr.bf16.mxu0 %v1084_v4  ;;  %1040 = vmatprep.subr.bf16.mxu1 %v1084_v4  ;;  %v1095_v11 = vld [vmem:[%s1477_s5 + $0x40] ss:$8 sps:$4 sm:$0xff]   ;;  %v1096_v12 = vld [vmem:[%s1477_s5 + $0x54] ss:$8 sps:$4 sm:$0xff]   ;;  %v1098_v13 = vld [vmem:[%s1477_s5 + $0x50] ss:$8 sps:$4 sm:$0xff]  }
  0x18   : > { %v1099_v14 = vld [vmem:[%s1477_s5 + $0x64] ss:$8 sps:$4 sm:$0xff]   ;;  %v346_v15 = vld [vmem:[%s1473_s1] sm:$0x3]  ;;  %v1102_v20 = vld [vmem:[%s1477_s5 + $0x74] ss:$8 sps:$4 sm:$0xff]  }
  0x19   : > { %v348_v16 = vld [vmem:[%s1474_s2] sm:$0x3]  ;;  %v347_v17 = vmul.f32 0.005, %v346_v15  ;;  %v1104_v23 = vld [vmem:[%s1477_s5 + $0x70] ss:$8 sps:$4 sm:$0xff]  }
  0x1a   : > { %645 = vmatpush1.bf16.msra.mxu0 %v1086_v5  ;;  %1056 = vmatpush1.bf16.msra.mxu1 %v1086_v5  ;;  %v349_v18 = vmul.f32 0.005, %v348_v16  ;;  %v1101_v19 = vld [vmem:[%s1477_s5 + $0x60] ss:$8 sps:$4 sm:$0xff]   ;;  %v1105_v24 = vld [vmem:[%s1477_s5 + $0x84] ss:$8 sps:$4 sm:$0xff]  }
  0x1b   : > { %646 = vmatprep.subr.bf16.mxu0 %v1087_v6  ;;  %1041 = vmatprep.subr.bf16.mxu1 %v1087_v6  ;;  %v350_v21 = vmul.f32 %v347_v17, %v347_v17  ;;  %v1107_v27 = vld [vmem:[%s1477_s5 + $0x80] ss:$8 sps:$4 sm:$0xff]   ;;  %v1108_v28 = vld [vmem:[%s1477_s5 + $0x94] ss:$8 sps:$4 sm:$0xff]   ;;  %v1110_v30 = vld [vmem:[%s1477_s5 + $0x90] ss:$8 sps:$4 sm:$0xff]  }
  0x1c   : > { %v1111_v31 = vld [vmem:[%s1477_s5 + $0xa4] ss:$8 sps:$4 sm:$0xff]   ;;  %v1289_v32 = vshrl.u32 %v377_v29, 7  ;;  %v1113_v33 = vld [vmem:[%s1477_s5 + $0xa0] ss:$8 sps:$4 sm:$0xff]   ;;  %v363_v43 = vld [vmem:[%s1205_s15 + $0x18] sm:$0xff] }
  0x1d   : > { %v351_v22 = vsub.f32 %v349_v18, %v350_v21  ;;  %v1114_v34 = vld [vmem:[%s1477_s5 + $0xb4] ss:$8 sps:$4 sm:$0xff]   ;;  %v353_v35 = vld [vmem:[%s1475_s3] sm:$0x3]  ;;  %v1116_v38 = vld [vmem:[%s1477_s5 + $0xb0] ss:$8 sps:$4 sm:$0xff]  }
  0x1e   : > { %647 = vmatpush1.bf16.msra.mxu0 %v1089_v7  ;;  %1057 = vmatpush1.bf16.msra.mxu1 %v1089_v7  ;;  %v1301_v36 = vsub.s32 1, %v1289_v32  ;;  %v1117_v39 = vld [vmem:[%s1477_s5 + $0xc4] ss:$8 sps:$4 sm:$0xff]   ;;  %v357_v41 = vld [vmem:[%s1476_s4] sm:$0x3]  ;;  %v1316_v46 = vsub.s32 0, %v1289_v32 }
  0x1f   : > { %648 = vmatprep.subr.bf16.mxu0 %v1090_v8  ;;  %1042 = vmatprep.subr.bf16.mxu1 %v1090_v8  ;;  %v352_v25 = vmax.f32 %v351_v22, 0.0  ;;  %v361_v42 = vld [vmem:[%s1205_s15 + $0x8] sm:$0xff]  ;;  %v371_v48 = vld [vmem:[%s1205_s15 + $0x58] sm:$0xff]  ;;  %v360_v59 = vld [vmem:[%s1205_s15] sm:$0xff]  ;;  %vm854_vm9 = vcmp.lt.s32.totalorder %v377_v29, 256 }
  0x20   : > { %v369_v47 = vld [vmem:[%s1205_s15 + $0x48] sm:$0xff]  ;;  %v1120_v53 = vld [vmem:[%s1477_s5 + $0xd4] ss:$8 sps:$4 sm:$0xff]   ;;  %v1122_v58 = vld [vmem:[%s1477_s5 + $0xd0] ss:$8 sps:$4 sm:$0xff]  }
  0x21   : > { %v354_v26 = vadd.f32 1e-05, %v352_v25  ;;  %v1119_v49 = vld [vmem:[%s1477_s5 + $0xc0] ss:$8 sps:$4 sm:$0xff]   ;;  %v362_v60 = vld [vmem:[%s1205_s15 + $0x10] sm:$0xff]  ;;  %v367_v5 = vld [vmem:[%s1205_s15 + $0x38] sm:$0xff] }
  0x22   : > { %649 = vmatpush1.bf16.msra.mxu0 %v1092_v9  ;;  %1058 = vmatpush1.bf16.msra.mxu1 %v1092_v9  ;;  %v368_v63 = vld [vmem:[%s1205_s15 + $0x40] sm:$0xff]  ;;  %v370_v0 = vld [vmem:[%s1205_s15 + $0x50] sm:$0xff]  ;;  %v365_v1 = vld [vmem:[%s1205_s15 + $0x28] sm:$0xff] }
  0x23   : > { %650 = vmatprep.subr.bf16.mxu0 %v1093_v10  ;;  %1043 = vmatprep.subr.bf16.mxu1 %v1093_v10  ;;  %1129 = vrsqrt.f32 %v354_v26  ;;  %v1123_v2 = vld [vmem:[%s1477_s5 + $0xe4] ss:$8 sps:$4 sm:$0xff]   ;;  %v1125_v16 = vld [vmem:[%s1477_s5 + $0xe0] ss:$8 sps:$4 sm:$0xff]  }
  0x24   : > { %v373_v6 = vld [vmem:[%s1205_s15 + $0x68] sm:$0xff] }
  0x26   : > { %651 = vmatpush1.bf16.msra.mxu0 %v1095_v11  ;;  %1059 = vmatpush1.bf16.msra.mxu1 %v1095_v11  ;;  %v375_v11 = vld [vmem:[%s1205_s15 + $0x78] sm:$0xff] }
  0x27   : > { %652 = vmatprep.subr.bf16.mxu0 %v1096_v12  ;;  %1044 = vmatprep.subr.bf16.mxu1 %v1096_v12 }
  0x2a   : > { %653 = vmatpush1.bf16.msra.mxu0 %v1098_v13  ;;  %1060 = vmatpush1.bf16.msra.mxu1 %v1098_v13 }
  0x2b   : > { %654 = vmatprep.subr.bf16.mxu0 %v1099_v14  ;;  %1045 = vmatprep.subr.bf16.mxu1 %v1099_v14 }
  0x2d   : > { %v1130_v37 = vpop.eup %1129 }
  0x2e   : > { %655 = vmatpush1.bf16.msra.mxu0 %v1101_v19  ;;  %1061 = vmatpush1.bf16.msra.mxu1 %v1101_v19  ;;  %v356_v40 = vmul.f32 %v1130_v37, %v353_v35  ;;  %v1126_v19 = vld [vmem:[%s1477_s5 + $0xf4] ss:$8 sps:$4 sm:$0xff]  }
  0x2f   : > { %656 = vmatprep.subr.bf16.mxu0 %v1102_v20  ;;  %1046 = vmatprep.subr.bf16.mxu1 %v1102_v20  ;;  %v374_v35 = vld [vmem:[%s1205_s15 + $0x70] sm:$0xff] }
  0x30   : > { %v358_v44 = vmul.f32 %v356_v40, %v347_v17  ;;  %v384_v45 = vrot.slane %v356_v40, %v1301_v36  ;;  %v380_v56 = vrot.slane %v356_v40, %v1316_v46 }
  0x32   : > { %657 = vmatpush1.bf16.msra.mxu0 %v1104_v23  ;;  %1062 = vmatpush1.bf16.msra.mxu1 %v1104_v23  ;;  %v359_v50 = vsub.f32 %v357_v41, %v358_v44  ;;  %v388_v51 = vmul.f32 %v384_v45, %v361_v42  ;;  %v390_v52 = vmul.f32 %v384_v45, %v363_v43  ;;  %v1128_v23 = vld [vmem:[%s1477_s5 + $0xf0] ss:$8 sps:$4 sm:$0xff]  }
  0x33   : > { %658 = vmatprep.subr.bf16.mxu0 %v1105_v24  ;;  %1047 = vmatprep.subr.bf16.mxu1 %v1105_v24  ;;  %v396_v54 = vmul.f32 %v384_v45, %v369_v47  ;;  %v398_v57 = vmul.f32 %v384_v45, %v371_v48  ;;  %v387_v8 = vmul.f32 %v380_v56, %v360_v59 }
  0x34   : > { %v411_v55 = vrot.slane %v359_v50, %v1301_v36  ;;  %v389_v9 = vmul.f32 %v380_v56, %v362_v60  ;;  %v407_v10 = vrot.slane %v359_v50, %v1316_v46  ;;  %v395_v13 = vmul.f32 %v380_v56, %v368_v63 }
  0x35   : > { %v397_v14 = vmul.f32 %v380_v56, %v370_v0  ;;  %v392_v15 = vmul.f32 %v384_v45, %v365_v1  ;;  %v394_v17 = vmul.f32 %v384_v45, %v367_v5  ;;  %v400_v18 = vmul.f32 %v384_v45, %v373_v6 }
  0x36   : > { %659 = vmatpush1.bf16.msra.mxu0 %v1107_v27  ;;  %1063 = vmatpush1.bf16.msra.mxu1 %v1107_v27  ;;  %v415_v61 = vadd.f32 %v411_v55, %v388_v51  ;;  %v417_v62 = vadd.f32 %v411_v55, %v390_v52  ;;  %v423_v3 = vadd.f32 %v411_v55, %v396_v54  ;;  %v364_v27 = vld [vmem:[%s1205_s15 + $0x20] sm:$0xff]  ;;  %v749_v52 = vadd.s32 8, %v1289_v32 }
  0x37   : > { %660 = vmatprep.subr.bf16.mxu0 %v1108_v28  ;;  %1048 = vmatprep.subr.bf16.mxu1 %v1108_v28  ;;  %v425_v4 = vadd.f32 %v411_v55, %v398_v57  ;;  %v402_v20 = vmul.f32 %v384_v45, %v375_v11  ;;  %v414_v21 = vadd.f32 %v407_v10, %v387_v8  ;;  %v752_v54 = vadd.s32 32, %v1289_v32 }
  0x38   : > { %v431_v7 = vpack.c.bf16 %v417_v62, %v415_v61  ;;  %v416_v22 = vadd.f32 %v407_v10, %v389_v9  ;;  %v422_v24 = vadd.f32 %v407_v10, %v395_v13  ;;  %v424_v25 = vadd.f32 %v407_v10, %v397_v14 }
  0x39   : > { %v435_v12 = vpack.c.bf16 %v425_v4, %v423_v3  ;;  %v419_v26 = vadd.f32 %v411_v55, %v392_v15  ;;  %v421_v28 = vadd.f32 %v411_v55, %v394_v17  ;;  %v401_v42 = vmul.f32 %v380_v56, %v374_v35 }
  0x3a   : > { %661 = vmatpush1.bf16.msra.mxu0 %v1110_v30  ;;  %1064 = vmatpush1.bf16.msra.mxu1 %v1110_v30  ;;  %v366_v30 = vld [vmem:[%s1205_s15 + $0x30] sm:$0xff]  ;;  %v430_v37 = vpack.c.bf16 %v416_v22, %v414_v21  ;;  %v750_v57 = vadd.s32 16, %v1289_v32  ;;  %v751_v60 = vadd.s32 24, %v1289_v32  ;;  %v755_v6 = vadd.s32 56, %v1289_v32 }
  0x3b   : > { %662 = vmatprep.subr.bf16.mxu0 %v1111_v31  ;;  %1049 = vmatprep.subr.bf16.mxu1 %v1111_v31  ;;  %v427_v31 = vadd.f32 %v411_v55, %v400_v18  ;;  %v393_v40 = vmul.f32 %v380_v56, %v366_v30  ;;  %v433_v43 = vpack.c.bf16 %v421_v28, %v419_v26 }
  0x3c   : > { %674 = vmatprep.mubr.bf16.mxu0 %v431_v7  ;;  %694 = vmatprep.mubr.bf16.mxu1 %v435_v12 }
  0x3d   : > { %v420_v47 = vadd.f32 %v407_v10, %v393_v40 }
  0x3e   : > { %663 = vmatpush1.bf16.msra.mxu0 %v1113_v33  ;;  %1065 = vmatpush1.bf16.msra.mxu1 %v1113_v33  ;;  %v429_v33 = vadd.f32 %v411_v55, %v402_v20  ;;  %v753_v55 = vadd.s32 40, %v1289_v32 }
  0x3f   : > { %664 = vmatprep.subr.bf16.mxu0 %v1114_v34  ;;  %1050 = vmatprep.subr.bf16.mxu1 %v1114_v34  ;;  %v372_v34 = vld [vmem:[%s1205_s15 + $0x60] sm:$0xff]  ;;  %s1034_s15 = sshll.u32 %s1197_s10, 6 }
  0x40   : > { %v399_v41 = vmul.f32 %v380_v56, %v372_v34  ;;  %v437_v44 = vpack.c.bf16 %v429_v33, %v427_v31 }
  0x42   : > { %665 = vmatpush1.bf16.msra.mxu0 %v1116_v38  ;;  %1066 = vmatpush1.bf16.msra.mxu1 %v1116_v38  ;;  %v391_v38 = vmul.f32 %v380_v56, %v364_v27  ;;  %v426_v48 = vadd.f32 %v407_v10, %v399_v41  ;;  %v470_v56 = vld [vmem:[%s1478_s6] sm:$0x3] }
  0x43   : > { %666 = vmatprep.subr.bf16.mxu0 %v1117_v39  ;;  %1051 = vmatprep.subr.bf16.mxu1 %v1117_v39  ;;  %v434_v39 = vpack.c.bf16 %v424_v25, %v422_v24  ;;  %v1367_v61 = vrot.slane %v470_v56, %v1316_v46  ;;  %v1372_v0 = vrot.slane %v470_v56, %v1301_v36 }
  0x44   : > { %v418_v45 = vadd.f32 %v407_v10, %v391_v38 }
  0x46   : > { %667 = vmatpush1.bf16.msra.mxu0 %v1119_v49  ;;  %1067 = vmatpush1.bf16.msra.mxu1 %v1119_v49  ;;  %v428_v49 = vadd.f32 %v407_v10, %v401_v42  ;;  %v432_v50 = vpack.c.bf16 %v420_v47, %v418_v45 }
  0x47   : > { %668 = vmatprep.subr.bf16.mxu0 %v1120_v53  ;;  %1052 = vmatprep.subr.bf16.mxu1 %v1120_v53  ;;  %v757_v53 = vstv %s1034_s15 }
  0x48   : > { %v436_v51 = vpack.c.bf16 %v428_v49, %v426_v48  ;;  %v759_v59 = vadd.s32 %v757_v53, %v749_v52  ;;  %v762_v62 = vadd.s32 %v757_v53, %v752_v54  ;;  %v1369_v63 = vadd.s32 %v757_v53, %v753_v55 }
  0x49   : > { %v1374_v1 = vadd.s32 %v757_v53, %v750_v57  ;;  %v1377_v5 = vadd.s32 %v757_v53, %v751_v60 }
  0x4a   : > { %669 = vmatpush1.bf16.msra.mxu0 %v1122_v58  ;;  %1068 = vmatpush1.bf16.msra.mxu1 %v1122_v58  ;;  %v758_v58 = vadd.s32 %v757_v53, %v1289_v32  ;;  %vm767_vm2 = vcmp.lt.s32.totalorder %v759_v59, 200  ;;  %vm770_vm3 = vcmp.lt.s32.totalorder %v762_v62, 200  ;;  %vm771_vm4 = vcmp.lt.s32.totalorder %v1369_v63, 200 }
  0x4b   : > { %670 = vmatprep.subr.bf16.mxu0 %v1123_v2  ;;  %1053 = vmatprep.subr.bf16.mxu1 %v1123_v2  ;;  %v754_v2 = vadd.s32 48, %v1289_v32  ;;  %vm768_vm5 = vcmp.lt.s32.totalorder %v1374_v1, 200  ;;  %vm769_vm6 = vcmp.lt.s32.totalorder %v1377_v5, 200 }
  0x4c   : > { %vm766_vm1 = vcmp.lt.s32.totalorder %v758_v58, 200 }
  0x4d   : > { %v1386_v13 = vadd.s32 %v757_v53, %v754_v2 }
  0x4e   : > { %671 = vmatpush1.bf16.msra.mxu0 %v1125_v16  ;;  %1069 = vmatpush1.bf16.msra.mxu1 %v1125_v16 }
  0x4f   : > { %672 = vmatprep.subr.bf16.mxu0 %v1126_v19  ;;  %1054 = vmatprep.subr.bf16.mxu1 %v1126_v19  ;;  %vm772_vm7 = vcmp.lt.s32.totalorder %v1386_v13, 200 }
  0x52   : > { %673 = vmatpush1.bf16.msra.mxu0 %v1128_v23  ;;  %1070 = vmatpush1.bf16.msra.mxu1 %v1128_v23  ;;  %v1392_v23 = vadd.s32 %v757_v53, %v755_v6 }
  0x54   : > { %vm773_vm8 = vcmp.lt.s32.totalorder %v1392_v23, 200 }
  0x55   : > { %675 = vmatmul.mubr.bf16.vlgmr.msra.gmra.mrb[0].mxu0 %v430_v37  ;;  %695 = vmatmul.mubr.bf16.vlgmr.msra.gmra.mrb[0].mxu1 %v434_v39 }
  0x56   : > { %684 = vmatprep.mubr.bf16.mxu0 %v433_v43  ;;  %704 = vmatprep.mubr.bf16.mxu1 %v437_v44 }
  0x5d   : > { %685 = vmatmul.mubr.bf16.gmra.mrb[4].mxu0 %v432_v50  ;;  %705 = vmatmul.mubr.bf16.gmra.mrb[4].mxu1 %v436_v51 }
 0x128   : > { %v676_v3 = vpop.f32.mrb[0].mxu0  ;;  %v696_v4 = vpop.f32.mrb[0].mxu1 }
 0x129   : > { %v677_v46 = vadd.f32 %v676_v3, %v1367_v61  ;;  %v678_v7 = vpop.f32.mrb[1].mxu0  ;;  %v697_v8 = vadd.f32 %v696_v4, %v1367_v61  ;;  %v698_v36 = vpop.f32.mrb[1].mxu1 }
 0x12a   : > { %v679_v9 = vadd.f32 %v678_v7, %v1372_v0  ;;  %v680_v10 = vpop.f32.mrb[2].mxu0  ;;  %v699_v11 = vadd.f32 %v698_v36, %v1372_v0  ;;  %v700_v12 = vpop.f32.mrb[2].mxu1 }
 0x12b   : > { %v715_v14 = vmax.f32 %v677_v46, 0.0  ;;  %v681_v15 = vadd.f32 %v680_v10, %v1367_v61  ;;  %v682_v16 = vpop.f32.mrb[3].mxu0  ;;  %v723_v17 = vmax.f32 %v697_v8, 0.0  ;;  %v701_v18 = vadd.f32 %v700_v12, %v1367_v61  ;;  %v702_v19 = vpop.f32.mrb[3].mxu1 }
 0x12c   : > { %v716_v20 = vmax.f32 %v679_v9, 0.0  ;;  %v683_v21 = vadd.f32 %v682_v16, %v1372_v0  ;;  %v724_v22 = vmax.f32 %v699_v11, 0.0  ;;  %v703_v31 = vadd.f32 %v702_v19, %v1372_v0 }
 0x12d   : > { %731 = vst [vmem:[%s1210_s18] sm:$0xff] %v715_v14  ;;  %v790_v24 = vsel %vm766_vm1, %v715_v14, 0.0  ;;  %v717_v25 = vmax.f32 %v681_v15, 0.0  ;;  %739 = vst [vmem:[%s1210_s18 + $0x40] sm:$0xff] %v723_v17  ;;  %v1398_v26 = vsel %vm770_vm3, %v723_v17, 0.0  ;;  %v725_v27 = vmax.f32 %v701_v18, 0.0 }
 0x12e   : > { %732 = vst [vmem:[%s1210_s18 + $0x8] sm:$0xff] %v716_v20  ;;  %v791_v28 = vsel %vm766_vm1, %v716_v20, 0.0  ;;  %v718_v30 = vmax.f32 %v683_v21, 0.0  ;;  %740 = vst [vmem:[%s1210_s18 + $0x48] sm:$0xff] %v724_v22  ;;  %v858_v33 = vmul.f32 %v790_v24, %v790_v24  ;;  %v1409_v37 = vmul.f32 %v1398_v26, %v1398_v26 }
 0x12f   : > { %v859_v34 = vmul.f32 %v791_v28, %v791_v28  ;;  %733 = vst [vmem:[%s1210_s18 + $0x10] sm:$0xff] %v717_v25  ;;  %v792_v35 = vsel %vm767_vm2, %v717_v25, 0.0  ;;  %741 = vst [vmem:[%s1210_s18 + $0x50] sm:$0xff] %v725_v27  ;;  %v799_v41 = vsel %vm770_vm3, %v724_v22, 0.0  ;;  %v800_v47 = vsel %vm771_vm4, %v725_v27, 0.0 }
 0x130   : > { %v807_v38 = vadd.f32 %v792_v35, %v790_v24  ;;  %v860_v39 = vmul.f32 %v792_v35, %v792_v35  ;;  %734 = vst [vmem:[%s1210_s18 + $0x18] sm:$0xff] %v718_v30  ;;  %v793_v40 = vsel %vm767_vm2, %v718_v30, 0.0  ;;  %v686_v42 = vpop.f32.mrb[4].mxu0  ;;  %v706_v43 = vpop.f32.mrb[4].mxu1  ;;  %v726_v52 = vmax.f32 %v703_v31, 0.0 }
 0x131   : > { %v820_v44 = vadd.f32 %v793_v40, %v791_v28  ;;  %v861_v45 = vmul.f32 %v793_v40, %v793_v40  ;;  %v687_v48 = vadd.f32 %v686_v42, %v1367_v61  ;;  %v688_v49 = vpop.f32.mrb[5].mxu0  ;;  %v708_v50 = vpop.f32.mrb[5].mxu1  ;;  %v707_v55 = vadd.f32 %v706_v43, %v1367_v61 }
 0x132   : > { %v874_v51 = vadd.f32 %v860_v39, %v858_v33  ;;  %v689_v53 = vadd.f32 %v688_v49, %v1372_v0  ;;  %v690_v54 = vpop.f32.mrb[6].mxu0  ;;  %v710_v56 = vpop.f32.mrb[6].mxu1  ;;  %v709_v62 = vadd.f32 %v708_v50, %v1372_v0  ;;  %v867_v3 = vmul.f32 %v799_v41, %v799_v41  ;;  %742 = vst [vmem:[%s1210_s18 + $0x58] sm:$0xff] %v726_v52 }
 0x133   : > { %v887_v57 = vadd.f32 %v861_v45, %v859_v34  ;;  %v719_v58 = vmax.f32 %v687_v48, 0.0  ;;  %v691_v59 = vadd.f32 %v690_v54, %v1367_v61  ;;  %v692_v60 = vpop.f32.mrb[7].mxu0  ;;  %v712_v2 = vpop.f32.mrb[7].mxu1  ;;  %v727_v46 = vmax.f32 %v707_v55, 0.0 }
 0x134   : > { %v720_v4 = vmax.f32 %v689_v53, 0.0  ;;  %v693_v6 = vadd.f32 %v692_v60, %v1372_v0  ;;  %v868_v7 = vmul.f32 %v800_v47, %v800_v47  ;;  %v728_v9 = vmax.f32 %v709_v62, 0.0 }
 0x135   : > { %735 = vst [vmem:[%s1210_s18 + $0x20] sm:$0xff] %v719_v58  ;;  %v794_v8 = vsel %vm768_vm5, %v719_v58, 0.0  ;;  %v721_v36 = vmax.f32 %v691_v59, 0.0  ;;  %743 = vst [vmem:[%s1210_s18 + $0x60] sm:$0xff] %v727_v46  ;;  %v801_v15 = vsel %vm771_vm4, %v726_v52, 0.0  ;;  %v802_v63 = vsel %vm772_vm7, %v727_v46, 0.0 }
 0x136   : > { %v808_v10 = vadd.f32 %v807_v38, %v794_v8  ;;  %v862_v11 = vmul.f32 %v794_v8, %v794_v8  ;;  %736 = vst [vmem:[%s1210_s18 + $0x28] sm:$0xff] %v720_v4  ;;  %v795_v12 = vsel %vm768_vm5, %v720_v4, 0.0  ;;  %v722_v14 = vmax.f32 %v693_v6, 0.0  ;;  %744 = vst [vmem:[%s1210_s18 + $0x68] sm:$0xff] %v728_v9 }
 0x137   : > { %v821_v16 = vadd.f32 %v820_v44, %v795_v12  ;;  %v863_v17 = vmul.f32 %v795_v12, %v795_v12  ;;  %737 = vst [vmem:[%s1210_s18 + $0x30] sm:$0xff] %v721_v36  ;;  %v796_v18 = vsel %vm769_vm6, %v721_v36, 0.0  ;;  %v803_v30 = vsel %vm772_vm7, %v728_v9, 0.0 }
 0x138   : > { %v875_v19 = vadd.f32 %v874_v51, %v862_v11  ;;  %v809_v20 = vadd.f32 %v808_v10, %v796_v18  ;;  %v864_v21 = vmul.f32 %v796_v18, %v796_v18  ;;  %738 = vst [vmem:[%s1210_s18 + $0x38] sm:$0xff] %v722_v14  ;;  %v797_v1 = vsel %vm769_vm6, %v722_v14, 0.0 }
 0x139   : > { %v888_v22 = vadd.f32 %v887_v57, %v863_v17  ;;  %v822_v24 = vadd.f32 %v821_v16, %v797_v1  ;;  %v865_v25 = vmul.f32 %v797_v1, %v797_v1  ;;  %v711_v31 = vadd.f32 %v710_v56, %v1367_v61 }
 0x13a   : > { %v810_v27 = vadd.f32 %v809_v20, %v1398_v26  ;;  %v876_v28 = vadd.f32 %v875_v19, %v864_v21  ;;  %v869_v33 = vmul.f32 %v801_v15, %v801_v15  ;;  %v713_v5 = vadd.f32 %v712_v2, %v1372_v0 }
 0x13b   : > { %v823_v34 = vadd.f32 %v822_v24, %v799_v41  ;;  %v889_v35 = vadd.f32 %v888_v22, %v865_v25  ;;  %v870_v40 = vmul.f32 %v802_v63, %v802_v63  ;;  %v729_v42 = vmax.f32 %v711_v31, 0.0 }
 0x13c   : > { %v877_v38 = vadd.f32 %v876_v28, %v1409_v37  ;;  %v811_v39 = vadd.f32 %v810_v27, %v800_v47  ;;  %v871_v44 = vmul.f32 %v803_v30, %v803_v30  ;;  %v730_v45 = vmax.f32 %v713_v5, 0.0 }
 0x13d   : > { %v890_v43 = vadd.f32 %v889_v35, %v867_v3  ;;  %v824_v26 = vadd.f32 %v823_v34, %v801_v15  ;;  %745 = vst [vmem:[%s1210_s18 + $0x70] sm:$0xff] %v729_v42  ;;  %v804_v61 = vsel %vm773_vm8, %v729_v42, 0.0  ;;  %v1140_v62 = vmov 1966171168  }
 0x13e   : > { %v812_v13 = vadd.f32 %v811_v39, %v802_v63  ;;  %v878_v48 = vadd.f32 %v877_v38, %v868_v7  ;;  %746 = vst [vmem:[%s1210_s18 + $0x78] sm:$0xff] %v730_v45  ;;  %v805_v0 = vsel %vm773_vm8, %v730_v45, 0.0  ;;  %v872_v50 = vmul.f32 %v804_v61, %v804_v61  ;;  %v806_v63 = vld [vmem:[%s1480_s8] sm:$0x3] }
 0x13f   : > { %v825_v41 = vadd.f32 %v824_v26, %v803_v30  ;;  %v891_v49 = vadd.f32 %v890_v43, %v869_v33  ;;  %v873_v53 = vmul.f32 %v805_v0, %v805_v0  ;;  %v837_v2 = vunpack.c.l.s4 %v1140_v62  ;;  %v857_v30 = vld [vmem:[%s1481_s9] sm:$0x3] }
 0x140   : > { %v879_v37 = vadd.f32 %v878_v48, %v870_v40  ;;  %v813_v47 = vadd.f32 %v812_v13, %v804_v61 }
 0x141   : > { %v892_v51 = vadd.f32 %v891_v49, %v871_v44  ;;  %v826_v52 = vadd.f32 %v825_v41, %v805_v0  ;;  %v838_v9 = vunpack.c.0.s8 %v837_v2 }
 0x142   : > { %v814_v54 = vrot.slane %v813_v47, 4  ;;  %v880_v55 = vadd.f32 %v879_v37, %v872_v50 }
 0x143   : > { %v827_v56 = vrot.slane %v826_v52, 4  ;;  %v893_v57 = vadd.f32 %v892_v51, %v873_v53  ;;  %v841_v19 = vsub.s32 %v838_v9, %v1289_v32 }
 0x144   : > { %v815_v58 = vadd.f32 %v814_v54, %v813_v47  ;;  %v881_v59 = vrot.slane %v880_v55, 4 }
 0x145   : > { %v828_v60 = vadd.f32 %v827_v56, %v826_v52  ;;  %v894_v3 = vrot.slane %v893_v57, 4 }
 0x146   : > { %v816_v4 = vrot.slane %v815_v58, 2  ;;  %v882_v6 = vadd.f32 %v881_v59, %v880_v55 }
 0x147   : > { %v829_v23 = vrot.slane %v828_v60, 2  ;;  %v895_v46 = vadd.f32 %v894_v3, %v893_v57 }
 0x148   : > { %v817_v7 = vadd.f32 %v816_v4, %v815_v58  ;;  %v883_v8 = vrot.slane %v882_v6, 2 }
 0x149   : > { %v830_v36 = vadd.f32 %v829_v23, %v828_v60  ;;  %v896_v10 = vrot.slane %v895_v46, 2 }
 0x14a   : > { %v818_v11 = vrot.slane %v817_v7, 1  ;;  %v884_v12 = vadd.f32 %v883_v8, %v882_v6 }
 0x14b   : > { %v831_v14 = vrot.slane %v830_v36, 1  ;;  %v897_v15 = vadd.f32 %v896_v10, %v895_v46 }
 0x14c   : > { %v819_v16 = vadd.f32 %v818_v11, %v817_v7  ;;  %v885_v17 = vrot.slane %v884_v12, 1 }
 0x14d   : > { %v832_v18 = vadd.f32 %v831_v14, %v830_v36  ;;  %v898_v20 = vrot.slane %v897_v15, 1 }
 0x14e   : > { %v886_v21 = vadd.f32 %v885_v17, %v884_v12 }
 0x14f   : > { %v835_v1 = vcombine.low %v819_v16, %v832_v18  ;;  %v899_v22 = vadd.f32 %v898_v20, %v897_v15 }
 0x151   : > { %v842_v24 = vrot.slane %v835_v1, %v841_v19  ;;  %v902_v25 = vcombine.low %v886_v21, %v899_v22 }
 0x153   : > { %v849_v27 = vrot.slane %v842_v24, %v841_v19  ;;  %v909_v28 = vrot.slane %v902_v25, %v841_v19 }
 0x155   : > { %v851_v31 = vadd.f32 %v849_v27, %v806_v63  ;;  %v916_v32 = vrot.slane %v909_v28, %v841_v19 }
 0x157   : > { %856 = vst.msk [vmem:[%s1480_s8] sm:$0x3] %vm854_vm9, %v851_v31  ;;  %v918_v33 = vadd.f32 %v916_v32, %v857_v30 }
 0x159   : > { %919 = vst.msk [vmem:[%s1481_s9] sm:$0x3] %vm854_vm9, %v918_v33 }
 0x15a PF: > { %s20_s30 = sadd.s32 1, %s1137_s30  }
 0x15b   : > { %p17_p5 = scmp.ge.s32.totalorder %s20_s30, 6  }
 0x15d   :  { %19 = sbr.rel (!%p17_p5) target bundleno = 1 (0x1), region = 98 }

</bundles_post_ra>
